<compile_context>
chip_gen: v7x
topology: tpu7x:2x2x1
jax: 0.10.0
libtpu: 0.0.40
codegen_flags: <defaults>
</compile_context>

<pallas_src>
import numpy as np
import jax
import jax.numpy as jnp
from jax import lax
from jax.experimental import pallas as pl
from jax.experimental.pallas import tpu as pltpu

NUM_CLASSES = 10
EPS = 1e-5
FC_PAD = 128   # lane-dense output width for the classifier store
B_TILE = 8     # images per grid step (multiple of 8 -> sublane-aligned reshapes)


# ----------------------------------------------------------------------------
# Fused kernel: 4x (conv 3x3/s2/p1 + folded-BN + ReLU) + avgpool + linear
# ----------------------------------------------------------------------------
def _fused_kernel(*refs):
    """refs = patches_ref, (w_mat, bias) x n_layers, w_fc, b_fc, out_ref.

    patches_ref : [Ho1, Wo1, B_TILE, 9*Cin0]  layer-1 im2col (built in wrapper)
    w_mat_l     : [9*Cin_l, Cout_l] bf16      BN-scale-folded conv weights
    bias_l      : [1, Cout_l]       f32       folded BN bias
    w_fc        : [C_last, FC_PAD]  bf16      zero-padded classifier weights
    b_fc        : [1, FC_PAD]       f32
    out_ref     : [B_TILE, FC_PAD]  f32
    """
    n_layers = (len(refs) - 4) // 2
    x_ref = refs[0]
    layer_refs = refs[1:1 + 2 * n_layers]
    wfc_ref = refs[1 + 2 * n_layers]
    bfc_ref = refs[2 + 2 * n_layers]
    o_ref = refs[3 + 2 * n_layers]

    ho, wo, bt, k0 = x_ref.shape

    def matmul_bias_relu(a_f32, w_ref, b_ref):
        # bf16 MXU inputs, f32 accumulation, f32 epilogue (+bias, ReLU).
        y = jnp.dot(a_f32.astype(jnp.bfloat16), w_ref[...],
                    preferred_element_type=jnp.float32)
        return jnp.maximum(y + b_ref[...], 0.0)

    # ---- Layer 1: wrapper-side im2col -> single [Ho*Wo*B, 27] x [27, 16] ----
    a = x_ref[...].reshape(ho * wo * bt, k0)
    y = matmul_bias_relu(a, layer_refs[0], layer_refs[1])
    x = y.reshape(ho, wo, bt, layer_refs[0].shape[1])   # f32 activations

    # ---- Layers 2..n: in-kernel slab im2col + ONE fused matmul per layer ----
    for li in range(1, n_layers):
        w_ref, b_ref = layer_refs[2 * li], layer_refs[2 * li + 1]
        hi, wi, _, c = x.shape
        ho, wo = hi // 2, wi // 2
        # Zero-pad H and W by 1 (concats along outer dims only; (bt, c) stay
        # the tiled sublane/lane dims throughout).
        zr = jnp.zeros((1, wi, bt, c), x.dtype)
        xh = jnp.concatenate([zr, x, zr], axis=0)             # [hi+2, wi, bt, c]
        zc = jnp.zeros((hi + 2, 1, bt, c), x.dtype)
        xp = jnp.concatenate([zc, xh, zc], axis=1)            # [hi+2, wi+2, bt, c]
        taps = []
        for ky in range(3):
            for kx in range(3):
                sub = xp[ky:ky + hi, kx:kx + wi]              # [hi, wi, bt, c]
                sub = sub.reshape(ho, 2, wi, bt, c)[:, 0]     # stride-2 rows
                sub = sub.reshape(ho, wo, 2, bt, c)[:, :, 0]  # stride-2 cols
                taps.append(sub)                              # [ho, wo, bt, c]
        patches = jnp.concatenate(taps, axis=-1)              # [ho, wo, bt, 9c]
        a = patches.reshape(ho * wo * bt, 9 * c)
        y = matmul_bias_relu(a, w_ref, b_ref)
        x = y.reshape(ho, wo, bt, w_ref.shape[1])

    # ---- AdaptiveAvgPool2d(1) + Linear (lane-dense FC_PAD-wide store) ----
    pooled = jnp.mean(x, axis=(0, 1))                         # [bt, C_last] f32
    logits = jnp.dot(pooled.astype(jnp.bfloat16), wfc_ref[...],
                     preferred_element_type=jnp.float32) + bfc_ref[...]
    o_ref[...] = logits


# ----------------------------------------------------------------------------
# Host-side parameter construction (mimics torch module init, eval-mode BN)
# ----------------------------------------------------------------------------
def init_params(key):
    cfgs = [(3, 16), (16, 32), (32, 64), (64, 128)]
    conv_params = []
    for cin, cout in cfgs:
        key, k1, k2, k3, k4, k5 = jax.random.split(key, 6)
        w = jax.random.normal(k1, (cout, cin, 3, 3), jnp.float32) / np.sqrt(cin * 9)
        gamma = 1.0 + 0.1 * jax.random.normal(k2, (cout,), jnp.float32)
        beta = 0.1 * jax.random.normal(k3, (cout,), jnp.float32)
        rmean = 0.1 * jax.random.normal(k4, (cout,), jnp.float32)
        rvar = 0.5 + 0.5 * jnp.abs(jax.random.normal(k5, (cout,), jnp.float32))
        conv_params.append((w, gamma, beta, rmean, rvar))
    key, kw, kb = jax.random.split(key, 3)
    w_fc = jax.random.normal(kw, (NUM_CLASSES, 128), jnp.float32) / np.sqrt(128.0)
    b_fc = 0.1 * jax.random.normal(kb, (NUM_CLASSES,), jnp.float32)
    return conv_params, (w_fc, b_fc)


# ----------------------------------------------------------------------------
# Forward passes
# ----------------------------------------------------------------------------
def forward_pallas(x_nchw, conv_params, fc_params, b_tile=B_TILE):
    assert b_tile % 8 == 0
    x = jnp.transpose(x_nchw, (0, 2, 3, 1)).astype(jnp.float32)   # NCHW -> NHWC
    N, H, W, Cin = x.shape
    assert H % 2 == 0 and W % 2 == 0

    # Pad batch to a multiple of the batch tile (padded rows sliced off below).
    n_pad = pl.cdiv(N, b_tile) * b_tile
    if n_pad != N:
        x = jnp.concatenate([x, jnp.zeros((n_pad - N, H, W, Cin), x.dtype)], 0)

    # Layer-1 im2col in the wrapper (XLA): [Ho1, Wo1, N_pad, 9*Cin].
    ho1, wo1 = H // 2, W // 2
    xp = jnp.pad(x, ((0, 0), (1, 1), (1, 1), (0, 0)))
    taps = [xp[:, ky:ky + H:2, kx:kx + W:2, :]
            for ky in range(3) for kx in range(3)]
    patches = jnp.concatenate(taps, axis=-1)            # [N_pad, Ho1, Wo1, 9*Cin]
    patches = jnp.transpose(patches, (1, 2, 0, 3))      # [Ho1, Wo1, N_pad, 9*Cin]

    operands = [patches]
    in_specs = [pl.BlockSpec((ho1, wo1, b_tile, 9 * Cin), lambda n: (0, 0, n, 0))]

    # Per-layer BN-folded weights (fold in f32, then cast to bf16) + f32 bias.
    for w, gamma, beta, rmean, rvar in conv_params:
        cout, cin = w.shape[0], w.shape[1]
        inv_std = 1.0 / jnp.sqrt(rvar + EPS)
        scale = gamma * inv_std                                       # [Cout]
        bias = (beta - rmean * scale).reshape(1, cout).astype(jnp.float32)
        w_folded = w * scale[:, None, None, None]                     # f32 fold
        w_mat = jnp.transpose(w_folded, (2, 3, 1, 0)).reshape(
            9 * cin, cout).astype(jnp.bfloat16)                       # [9*Cin, Cout]
        operands += [w_mat, bias]
        in_specs += [pl.BlockSpec((9 * cin, cout), lambda n: (0, 0)),
                     pl.BlockSpec((1, cout), lambda n: (0, 0))]

    # Classifier: zero-pad 10 classes to 128 lanes for an unmasked store.
    w_fc, b_fc = fc_params
    nc, c_last = w_fc.shape
    w_fc_pad = jnp.zeros((c_last, FC_PAD), jnp.float32).at[:, :nc].set(
        w_fc.T).astype(jnp.bfloat16)
    b_fc_pad = jnp.zeros((1, FC_PAD), jnp.float32).at[:, :nc].set(b_fc)
    operands += [w_fc_pad, b_fc_pad]
    in_specs += [pl.BlockSpec((c_last, FC_PAD), lambda n: (0, 0)),
                 pl.BlockSpec((1, FC_PAD), lambda n: (0, 0))]

    out = pl.pallas_call(
        _fused_kernel,
        out_shape=jax.ShapeDtypeStruct((n_pad, FC_PAD), jnp.float32),
        grid=(n_pad // b_tile,),
        in_specs=in_specs,
        out_specs=pl.BlockSpec((b_tile, FC_PAD), lambda n: (n, 0)),
        compiler_params=pltpu.CompilerParams(
            dimension_semantics=("parallel",),     # v7x: shard batch tiles on 2 TCs
            vmem_limit_bytes=32 * 1024 * 1024,     # safe on v5e/v6e/v7x at this size
        ),
    )(*operands)
    return out[:N, :nc]


def forward_reference(x_nchw, conv_params, fc_params):
    # Pure-JAX f32 reference (HIGHEST precision) for correctness checking.
    x = jnp.transpose(x_nchw, (0, 2, 3, 1)).astype(jnp.float32)
    for w, gamma, beta, rmean, rvar in conv_params:
        w_hwio = jnp.transpose(w, (2, 3, 1, 0))
        y = lax.conv_general_dilated(
            x, w_hwio, (2, 2), ((1, 1), (1, 1)),
            dimension_numbers=("NHWC", "HWIO", "NHWC"),
            precision=lax.Precision.HIGHEST)
        y = (y - rmean) / jnp.sqrt(rvar + EPS) * gamma + beta
        x = jnp.maximum(y, 0.0)
    pooled = jnp.mean(x, axis=(1, 2))
    w_fc, b_fc = fc_params
    return jnp.dot(pooled, w_fc.T, precision=lax.Precision.HIGHEST) + b_fc


# ----------------------------------------------------------------------------
if __name__ == "__main__":
    key = jax.random.PRNGKey(0)
    key, kx, kp = jax.random.split(key, 3)
    N = 16                                                   # 2 grid steps of 8
    x = jax.random.normal(kx, (N, 3, 16, 16), jnp.float32)   # NCHW, like PyTorch
    conv_params, fc_params = init_params(kp)

    fwd = jax.jit(forward_pallas)
    out = jax.block_until_ready(fwd(x, conv_params, fc_params))
    ref = jax.block_until_ready(forward_reference(x, conv_params, fc_params))

    assert out.shape == (N, NUM_CLASSES), out.shape
    # bf16 MXU inputs (f32 accumulation/epilogue) vs f32 reference.
    assert np.allclose(np.asarray(out), np.asarray(ref), rtol=1e-1, atol=3e-2), (
        float(np.max(np.abs(np.asarray(out) - np.asarray(ref)))))
    print("KERNEL_OK")
</pallas_src>

<mosaic_0001>
module attributes {stable_mosaic.version = 11 : i64} {
  func.func @_fused_kernel(%arg0: i32, %arg1: memref<8x8x8x27xf32, #tpu.memory_space<vmem>>, %arg2: memref<27x16xbf16, #tpu.memory_space<vmem>>, %arg3: memref<1x16xf32, #tpu.memory_space<vmem>>, %arg4: memref<144x32xbf16, #tpu.memory_space<vmem>>, %arg5: memref<1x32xf32, #tpu.memory_space<vmem>>, %arg6: memref<288x64xbf16, #tpu.memory_space<vmem>>, %arg7: memref<1x64xf32, #tpu.memory_space<vmem>>, %arg8: memref<576x128xbf16, #tpu.memory_space<vmem>>, %arg9: memref<1x128xf32, #tpu.memory_space<vmem>>, %arg10: memref<128x128xbf16, #tpu.memory_space<vmem>>, %arg11: memref<1x128xf32, #tpu.memory_space<vmem>>, %arg12: memref<8x128xf32, #tpu.memory_space<vmem>>) attributes {dimension_semantics = [#tpu.dimension_semantics<parallel>], iteration_bounds = array<i64: 2>, scalar_prefetch = 0 : i64, scratch_operands = 0 : i64, tpu.core_type = #tpu.core_type<tc>, window_params = [{transform_indices = @transform_0, window_bounds = array<i64: 8, 8, 8, 27>}, {pipeline_mode = #tpu.pipeline_mode<synchronous>, transform_indices = @transform_1, window_bounds = array<i64: 27, 16>}, {pipeline_mode = #tpu.pipeline_mode<synchronous>, transform_indices = @transform_2, window_bounds = array<i64: 1, 16>}, {pipeline_mode = #tpu.pipeline_mode<synchronous>, transform_indices = @transform_3, window_bounds = array<i64: 144, 32>}, {pipeline_mode = #tpu.pipeline_mode<synchronous>, transform_indices = @transform_4, window_bounds = array<i64: 1, 32>}, {pipeline_mode = #tpu.pipeline_mode<synchronous>, transform_indices = @transform_5, window_bounds = array<i64: 288, 64>}, {pipeline_mode = #tpu.pipeline_mode<synchronous>, transform_indices = @transform_6, window_bounds = array<i64: 1, 64>}, {pipeline_mode = #tpu.pipeline_mode<synchronous>, transform_indices = @transform_7, window_bounds = array<i64: 576, 128>}, {pipeline_mode = #tpu.pipeline_mode<synchronous>, transform_indices = @transform_8, window_bounds = array<i64: 1, 128>}, {pipeline_mode = #tpu.pipeline_mode<synchronous>, transform_indices = @transform_9, window_bounds = array<i64: 128, 128>}, {pipeline_mode = #tpu.pipeline_mode<synchronous>, transform_indices = @transform_10, window_bounds = array<i64: 1, 128>}, {transform_indices = @transform_11, window_bounds = array<i64: 8, 128>}]} {
    %c0 = arith.constant 0 : index
    %c0_0 = arith.constant 0 : index
    %c0_1 = arith.constant 0 : index
    %c0_2 = arith.constant 0 : index
    %0 = vector.load %arg1[%c0, %c0_0, %c0_1, %c0_2] : memref<8x8x8x27xf32, #tpu.memory_space<vmem>>, vector<8x8x8x27xf32>
    %1 = vector.shape_cast %0 : vector<8x8x8x27xf32> to vector<512x27xf32>
    %2 = arith.truncf %1 : vector<512x27xf32> to vector<512x27xbf16>
    %c0_3 = arith.constant 0 : index
    %c0_4 = arith.constant 0 : index
    %3 = vector.load %arg2[%c0_3, %c0_4] : memref<27x16xbf16, #tpu.memory_space<vmem>>, vector<27x16xbf16>
    %cst = arith.constant dense<0.000000e+00> : vector<512x16xf32>
    %4 = tpu.matmul %2, %3, %cst {dimension_numbers = #tpu.dot_dimension_numbers<[1], [0], [0], [1], [0, 0, 1, 1], [], []>} : vector<512x27xbf16>, vector<27x16xbf16>, vector<512x16xf32> -> vector<512x16xf32>
    %c0_5 = arith.constant 0 : index
    %c0_6 = arith.constant 0 : index
    %5 = vector.load %arg3[%c0_5, %c0_6] : memref<1x16xf32, #tpu.memory_space<vmem>>, vector<1x16xf32>
    %6 = vector.broadcast %5 : vector<1x16xf32> to vector<512x16xf32>
    %7 = arith.addf %4, %6 : vector<512x16xf32>
    %cst_7 = arith.constant 0.000000e+00 : f32
    %8 = vector.broadcast %cst_7 : f32 to vector<512x16xf32>
    %9 = arith.maximumf %7, %8 : vector<512x16xf32>
    %10 = vector.shape_cast %9 : vector<512x16xf32> to vector<8x8x8x16xf32>
    %cst_8 = arith.constant 0.000000e+00 : f32
    %11 = vector.broadcast %cst_8 : f32 to vector<1x8x8x16xf32>
    %12 = tpu.concatenate %11, %10, %11 in 0 : vector<1x8x8x16xf32>, vector<8x8x8x16xf32>, vector<1x8x8x16xf32> -> vector<10x8x8x16xf32>
    %cst_9 = arith.constant 0.000000e+00 : f32
    %13 = vector.broadcast %cst_9 : f32 to vector<10x1x8x16xf32>
    %14 = tpu.concatenate %13, %12, %13 in 1 : vector<10x1x8x16xf32>, vector<10x8x8x16xf32>, vector<10x1x8x16xf32> -> vector<10x10x8x16xf32>
    %15 = vector.extract_strided_slice %14 {offsets = [0, 0, 0, 0], sizes = [8, 8, 8, 16], strides = [1, 1, 1, 1]} : vector<10x10x8x16xf32> to vector<8x8x8x16xf32>
    %16 = vector.shape_cast %15 : vector<8x8x8x16xf32> to vector<4x2x8x8x16xf32>
    %17 = vector.extract_strided_slice %16 {offsets = [0, 0, 0, 0, 0], sizes = [4, 1, 8, 8, 16], strides = [1, 1, 1, 1, 1]} : vector<4x2x8x8x16xf32> to vector<4x1x8x8x16xf32>
    %18 = vector.shape_cast %17 : vector<4x1x8x8x16xf32> to vector<4x8x8x16xf32>
    %19 = vector.shape_cast %18 : vector<4x8x8x16xf32> to vector<4x4x2x8x16xf32>
    %20 = vector.extract_strided_slice %19 {offsets = [0, 0, 0, 0, 0], sizes = [4, 4, 1, 8, 16], strides = [1, 1, 1, 1, 1]} : vector<4x4x2x8x16xf32> to vector<4x4x1x8x16xf32>
    %21 = vector.shape_cast %20 : vector<4x4x1x8x16xf32> to vector<4x4x8x16xf32>
    %22 = vector.extract_strided_slice %14 {offsets = [0, 1, 0, 0], sizes = [8, 8, 8, 16], strides = [1, 1, 1, 1]} : vector<10x10x8x16xf32> to vector<8x8x8x16xf32>
    %23 = vector.shape_cast %22 : vector<8x8x8x16xf32> to vector<4x2x8x8x16xf32>
    %24 = vector.extract_strided_slice %23 {offsets = [0, 0, 0, 0, 0], sizes = [4, 1, 8, 8, 16], strides = [1, 1, 1, 1, 1]} : vector<4x2x8x8x16xf32> to vector<4x1x8x8x16xf32>
    %25 = vector.shape_cast %24 : vector<4x1x8x8x16xf32> to vector<4x8x8x16xf32>
    %26 = vector.shape_cast %25 : vector<4x8x8x16xf32> to vector<4x4x2x8x16xf32>
    %27 = vector.extract_strided_slice %26 {offsets = [0, 0, 0, 0, 0], sizes = [4, 4, 1, 8, 16], strides = [1, 1, 1, 1, 1]} : vector<4x4x2x8x16xf32> to vector<4x4x1x8x16xf32>
    %28 = vector.shape_cast %27 : vector<4x4x1x8x16xf32> to vector<4x4x8x16xf32>
    %29 = vector.extract_strided_slice %14 {offsets = [0, 2, 0, 0], sizes = [8, 8, 8, 16], strides = [1, 1, 1, 1]} : vector<10x10x8x16xf32> to vector<8x8x8x16xf32>
    %30 = vector.shape_cast %29 : vector<8x8x8x16xf32> to vector<4x2x8x8x16xf32>
    %31 = vector.extract_strided_slice %30 {offsets = [0, 0, 0, 0, 0], sizes = [4, 1, 8, 8, 16], strides = [1, 1, 1, 1, 1]} : vector<4x2x8x8x16xf32> to vector<4x1x8x8x16xf32>
    %32 = vector.shape_cast %31 : vector<4x1x8x8x16xf32> to vector<4x8x8x16xf32>
    %33 = vector.shape_cast %32 : vector<4x8x8x16xf32> to vector<4x4x2x8x16xf32>
    %34 = vector.extract_strided_slice %33 {offsets = [0, 0, 0, 0, 0], sizes = [4, 4, 1, 8, 16], strides = [1, 1, 1, 1, 1]} : vector<4x4x2x8x16xf32> to vector<4x4x1x8x16xf32>
    %35 = vector.shape_cast %34 : vector<4x4x1x8x16xf32> to vector<4x4x8x16xf32>
    %36 = vector.extract_strided_slice %14 {offsets = [1, 0, 0, 0], sizes = [8, 8, 8, 16], strides = [1, 1, 1, 1]} : vector<10x10x8x16xf32> to vector<8x8x8x16xf32>
    %37 = vector.shape_cast %36 : vector<8x8x8x16xf32> to vector<4x2x8x8x16xf32>
    %38 = vector.extract_strided_slice %37 {offsets = [0, 0, 0, 0, 0], sizes = [4, 1, 8, 8, 16], strides = [1, 1, 1, 1, 1]} : vector<4x2x8x8x16xf32> to vector<4x1x8x8x16xf32>
    %39 = vector.shape_cast %38 : vector<4x1x8x8x16xf32> to vector<4x8x8x16xf32>
    %40 = vector.shape_cast %39 : vector<4x8x8x16xf32> to vector<4x4x2x8x16xf32>
    %41 = vector.extract_strided_slice %40 {offsets = [0, 0, 0, 0, 0], sizes = [4, 4, 1, 8, 16], strides = [1, 1, 1, 1, 1]} : vector<4x4x2x8x16xf32> to vector<4x4x1x8x16xf32>
    %42 = vector.shape_cast %41 : vector<4x4x1x8x16xf32> to vector<4x4x8x16xf32>
    %43 = vector.extract_strided_slice %14 {offsets = [1, 1, 0, 0], sizes = [8, 8, 8, 16], strides = [1, 1, 1, 1]} : vector<10x10x8x16xf32> to vector<8x8x8x16xf32>
    %44 = vector.shape_cast %43 : vector<8x8x8x16xf32> to vector<4x2x8x8x16xf32>
    %45 = vector.extract_strided_slice %44 {offsets = [0, 0, 0, 0, 0], sizes = [4, 1, 8, 8, 16], strides = [1, 1, 1, 1, 1]} : vector<4x2x8x8x16xf32> to vector<4x1x8x8x16xf32>
    %46 = vector.shape_cast %45 : vector<4x1x8x8x16xf32> to vector<4x8x8x16xf32>
    %47 = vector.shape_cast %46 : vector<4x8x8x16xf32> to vector<4x4x2x8x16xf32>
    %48 = vector.extract_strided_slice %47 {offsets = [0, 0, 0, 0, 0], sizes = [4, 4, 1, 8, 16], strides = [1, 1, 1, 1, 1]} : vector<4x4x2x8x16xf32> to vector<4x4x1x8x16xf32>
    %49 = vector.shape_cast %48 : vector<4x4x1x8x16xf32> to vector<4x4x8x16xf32>
    %50 = vector.extract_strided_slice %14 {offsets = [1, 2, 0, 0], sizes = [8, 8, 8, 16], strides = [1, 1, 1, 1]} : vector<10x10x8x16xf32> to vector<8x8x8x16xf32>
    %51 = vector.shape_cast %50 : vector<8x8x8x16xf32> to vector<4x2x8x8x16xf32>
    %52 = vector.extract_strided_slice %51 {offsets = [0, 0, 0, 0, 0], sizes = [4, 1, 8, 8, 16], strides = [1, 1, 1, 1, 1]} : vector<4x2x8x8x16xf32> to vector<4x1x8x8x16xf32>
    %53 = vector.shape_cast %52 : vector<4x1x8x8x16xf32> to vector<4x8x8x16xf32>
    %54 = vector.shape_cast %53 : vector<4x8x8x16xf32> to vector<4x4x2x8x16xf32>
    %55 = vector.extract_strided_slice %54 {offsets = [0, 0, 0, 0, 0], sizes = [4, 4, 1, 8, 16], strides = [1, 1, 1, 1, 1]} : vector<4x4x2x8x16xf32> to vector<4x4x1x8x16xf32>
    %56 = vector.shape_cast %55 : vector<4x4x1x8x16xf32> to vector<4x4x8x16xf32>
    %57 = vector.extract_strided_slice %14 {offsets = [2, 0, 0, 0], sizes = [8, 8, 8, 16], strides = [1, 1, 1, 1]} : vector<10x10x8x16xf32> to vector<8x8x8x16xf32>
    %58 = vector.shape_cast %57 : vector<8x8x8x16xf32> to vector<4x2x8x8x16xf32>
    %59 = vector.extract_strided_slice %58 {offsets = [0, 0, 0, 0, 0], sizes = [4, 1, 8, 8, 16], strides = [1, 1, 1, 1, 1]} : vector<4x2x8x8x16xf32> to vector<4x1x8x8x16xf32>
    %60 = vector.shape_cast %59 : vector<4x1x8x8x16xf32> to vector<4x8x8x16xf32>
    %61 = vector.shape_cast %60 : vector<4x8x8x16xf32> to vector<4x4x2x8x16xf32>
    %62 = vector.extract_strided_slice %61 {offsets = [0, 0, 0, 0, 0], sizes = [4, 4, 1, 8, 16], strides = [1, 1, 1, 1, 1]} : vector<4x4x2x8x16xf32> to vector<4x4x1x8x16xf32>
    %63 = vector.shape_cast %62 : vector<4x4x1x8x16xf32> to vector<4x4x8x16xf32>
    %64 = vector.extract_strided_slice %14 {offsets = [2, 1, 0, 0], sizes = [8, 8, 8, 16], strides = [1, 1, 1, 1]} : vector<10x10x8x16xf32> to vector<8x8x8x16xf32>
    %65 = vector.shape_cast %64 : vector<8x8x8x16xf32> to vector<4x2x8x8x16xf32>
    %66 = vector.extract_strided_slice %65 {offsets = [0, 0, 0, 0, 0], sizes = [4, 1, 8, 8, 16], strides = [1, 1, 1, 1, 1]} : vector<4x2x8x8x16xf32> to vector<4x1x8x8x16xf32>
    %67 = vector.shape_cast %66 : vector<4x1x8x8x16xf32> to vector<4x8x8x16xf32>
    %68 = vector.shape_cast %67 : vector<4x8x8x16xf32> to vector<4x4x2x8x16xf32>
    %69 = vector.extract_strided_slice %68 {offsets = [0, 0, 0, 0, 0], sizes = [4, 4, 1, 8, 16], strides = [1, 1, 1, 1, 1]} : vector<4x4x2x8x16xf32> to vector<4x4x1x8x16xf32>
    %70 = vector.shape_cast %69 : vector<4x4x1x8x16xf32> to vector<4x4x8x16xf32>
    %71 = vector.extract_strided_slice %14 {offsets = [2, 2, 0, 0], sizes = [8, 8, 8, 16], strides = [1, 1, 1, 1]} : vector<10x10x8x16xf32> to vector<8x8x8x16xf32>
    %72 = vector.shape_cast %71 : vector<8x8x8x16xf32> to vector<4x2x8x8x16xf32>
    %73 = vector.extract_strided_slice %72 {offsets = [0, 0, 0, 0, 0], sizes = [4, 1, 8, 8, 16], strides = [1, 1, 1, 1, 1]} : vector<4x2x8x8x16xf32> to vector<4x1x8x8x16xf32>
    %74 = vector.shape_cast %73 : vector<4x1x8x8x16xf32> to vector<4x8x8x16xf32>
    %75 = vector.shape_cast %74 : vector<4x8x8x16xf32> to vector<4x4x2x8x16xf32>
    %76 = vector.extract_strided_slice %75 {offsets = [0, 0, 0, 0, 0], sizes = [4, 4, 1, 8, 16], strides = [1, 1, 1, 1, 1]} : vector<4x4x2x8x16xf32> to vector<4x4x1x8x16xf32>
    %77 = vector.shape_cast %76 : vector<4x4x1x8x16xf32> to vector<4x4x8x16xf32>
    %78 = tpu.concatenate %21, %28, %35, %42, %49, %56, %63, %70, %77 in 3 : vector<4x4x8x16xf32>, vector<4x4x8x16xf32>, vector<4x4x8x16xf32>, vector<4x4x8x16xf32>, vector<4x4x8x16xf32>, vector<4x4x8x16xf32>, vector<4x4x8x16xf32>, vector<4x4x8x16xf32>, vector<4x4x8x16xf32> -> vector<4x4x8x144xf32>
    %79 = vector.shape_cast %78 : vector<4x4x8x144xf32> to vector<128x144xf32>
    %80 = arith.truncf %79 : vector<128x144xf32> to vector<128x144xbf16>
    %c0_10 = arith.constant 0 : index
    %c0_11 = arith.constant 0 : index
    %81 = vector.load %arg4[%c0_10, %c0_11] : memref<144x32xbf16, #tpu.memory_space<vmem>>, vector<144x32xbf16>
    %cst_12 = arith.constant dense<0.000000e+00> : vector<128x32xf32>
    %82 = tpu.matmul %80, %81, %cst_12 {dimension_numbers = #tpu.dot_dimension_numbers<[1], [0], [0], [1], [0, 0, 1, 1], [], []>} : vector<128x144xbf16>, vector<144x32xbf16>, vector<128x32xf32> -> vector<128x32xf32>
    %c0_13 = arith.constant 0 : index
    %c0_14 = arith.constant 0 : index
    %83 = vector.load %arg5[%c0_13, %c0_14] : memref<1x32xf32, #tpu.memory_space<vmem>>, vector<1x32xf32>
    %84 = vector.broadcast %83 : vector<1x32xf32> to vector<128x32xf32>
    %85 = arith.addf %82, %84 : vector<128x32xf32>
    %cst_15 = arith.constant 0.000000e+00 : f32
    %86 = vector.broadcast %cst_15 : f32 to vector<128x32xf32>
    %87 = arith.maximumf %85, %86 : vector<128x32xf32>
    %88 = vector.shape_cast %87 : vector<128x32xf32> to vector<4x4x8x32xf32>
    %cst_16 = arith.constant 0.000000e+00 : f32
    %89 = vector.broadcast %cst_16 : f32 to vector<1x4x8x32xf32>
    %90 = tpu.concatenate %89, %88, %89 in 0 : vector<1x4x8x32xf32>, vector<4x4x8x32xf32>, vector<1x4x8x32xf32> -> vector<6x4x8x32xf32>
    %cst_17 = arith.constant 0.000000e+00 : f32
    %91 = vector.broadcast %cst_17 : f32 to vector<6x1x8x32xf32>
    %92 = tpu.concatenate %91, %90, %91 in 1 : vector<6x1x8x32xf32>, vector<6x4x8x32xf32>, vector<6x1x8x32xf32> -> vector<6x6x8x32xf32>
    %93 = vector.extract_strided_slice %92 {offsets = [0, 0, 0, 0], sizes = [4, 4, 8, 32], strides = [1, 1, 1, 1]} : vector<6x6x8x32xf32> to vector<4x4x8x32xf32>
    %94 = vector.shape_cast %93 : vector<4x4x8x32xf32> to vector<2x2x4x8x32xf32>
    %95 = vector.extract_strided_slice %94 {offsets = [0, 0, 0, 0, 0], sizes = [2, 1, 4, 8, 32], strides = [1, 1, 1, 1, 1]} : vector<2x2x4x8x32xf32> to vector<2x1x4x8x32xf32>
    %96 = vector.shape_cast %95 : vector<2x1x4x8x32xf32> to vector<2x4x8x32xf32>
    %97 = vector.shape_cast %96 : vector<2x4x8x32xf32> to vector<2x2x2x8x32xf32>
    %98 = vector.extract_strided_slice %97 {offsets = [0, 0, 0, 0, 0], sizes = [2, 2, 1, 8, 32], strides = [1, 1, 1, 1, 1]} : vector<2x2x2x8x32xf32> to vector<2x2x1x8x32xf32>
    %99 = vector.shape_cast %98 : vector<2x2x1x8x32xf32> to vector<2x2x8x32xf32>
    %100 = vector.extract_strided_slice %92 {offsets = [0, 1, 0, 0], sizes = [4, 4, 8, 32], strides = [1, 1, 1, 1]} : vector<6x6x8x32xf32> to vector<4x4x8x32xf32>
    %101 = vector.shape_cast %100 : vector<4x4x8x32xf32> to vector<2x2x4x8x32xf32>
    %102 = vector.extract_strided_slice %101 {offsets = [0, 0, 0, 0, 0], sizes = [2, 1, 4, 8, 32], strides = [1, 1, 1, 1, 1]} : vector<2x2x4x8x32xf32> to vector<2x1x4x8x32xf32>
    %103 = vector.shape_cast %102 : vector<2x1x4x8x32xf32> to vector<2x4x8x32xf32>
    %104 = vector.shape_cast %103 : vector<2x4x8x32xf32> to vector<2x2x2x8x32xf32>
    %105 = vector.extract_strided_slice %104 {offsets = [0, 0, 0, 0, 0], sizes = [2, 2, 1, 8, 32], strides = [1, 1, 1, 1, 1]} : vector<2x2x2x8x32xf32> to vector<2x2x1x8x32xf32>
    %106 = vector.shape_cast %105 : vector<2x2x1x8x32xf32> to vector<2x2x8x32xf32>
    %107 = vector.extract_strided_slice %92 {offsets = [0, 2, 0, 0], sizes = [4, 4, 8, 32], strides = [1, 1, 1, 1]} : vector<6x6x8x32xf32> to vector<4x4x8x32xf32>
    %108 = vector.shape_cast %107 : vector<4x4x8x32xf32> to vector<2x2x4x8x32xf32>
    %109 = vector.extract_strided_slice %108 {offsets = [0, 0, 0, 0, 0], sizes = [2, 1, 4, 8, 32], strides = [1, 1, 1, 1, 1]} : vector<2x2x4x8x32xf32> to vector<2x1x4x8x32xf32>
    %110 = vector.shape_cast %109 : vector<2x1x4x8x32xf32> to vector<2x4x8x32xf32>
    %111 = vector.shape_cast %110 : vector<2x4x8x32xf32> to vector<2x2x2x8x32xf32>
    %112 = vector.extract_strided_slice %111 {offsets = [0, 0, 0, 0, 0], sizes = [2, 2, 1, 8, 32], strides = [1, 1, 1, 1, 1]} : vector<2x2x2x8x32xf32> to vector<2x2x1x8x32xf32>
    %113 = vector.shape_cast %112 : vector<2x2x1x8x32xf32> to vector<2x2x8x32xf32>
    %114 = vector.extract_strided_slice %92 {offsets = [1, 0, 0, 0], sizes = [4, 4, 8, 32], strides = [1, 1, 1, 1]} : vector<6x6x8x32xf32> to vector<4x4x8x32xf32>
    %115 = vector.shape_cast %114 : vector<4x4x8x32xf32> to vector<2x2x4x8x32xf32>
    %116 = vector.extract_strided_slice %115 {offsets = [0, 0, 0, 0, 0], sizes = [2, 1, 4, 8, 32], strides = [1, 1, 1, 1, 1]} : vector<2x2x4x8x32xf32> to vector<2x1x4x8x32xf32>
    %117 = vector.shape_cast %116 : vector<2x1x4x8x32xf32> to vector<2x4x8x32xf32>
    %118 = vector.shape_cast %117 : vector<2x4x8x32xf32> to vector<2x2x2x8x32xf32>
    %119 = vector.extract_strided_slice %118 {offsets = [0, 0, 0, 0, 0], sizes = [2, 2, 1, 8, 32], strides = [1, 1, 1, 1, 1]} : vector<2x2x2x8x32xf32> to vector<2x2x1x8x32xf32>
    %120 = vector.shape_cast %119 : vector<2x2x1x8x32xf32> to vector<2x2x8x32xf32>
    %121 = vector.extract_strided_slice %92 {offsets = [1, 1, 0, 0], sizes = [4, 4, 8, 32], strides = [1, 1, 1, 1]} : vector<6x6x8x32xf32> to vector<4x4x8x32xf32>
    %122 = vector.shape_cast %121 : vector<4x4x8x32xf32> to vector<2x2x4x8x32xf32>
    %123 = vector.extract_strided_slice %122 {offsets = [0, 0, 0, 0, 0], sizes = [2, 1, 4, 8, 32], strides = [1, 1, 1, 1, 1]} : vector<2x2x4x8x32xf32> to vector<2x1x4x8x32xf32>
    %124 = vector.shape_cast %123 : vector<2x1x4x8x32xf32> to vector<2x4x8x32xf32>
    %125 = vector.shape_cast %124 : vector<2x4x8x32xf32> to vector<2x2x2x8x32xf32>
    %126 = vector.extract_strided_slice %125 {offsets = [0, 0, 0, 0, 0], sizes = [2, 2, 1, 8, 32], strides = [1, 1, 1, 1, 1]} : vector<2x2x2x8x32xf32> to vector<2x2x1x8x32xf32>
    %127 = vector.shape_cast %126 : vector<2x2x1x8x32xf32> to vector<2x2x8x32xf32>
    %128 = vector.extract_strided_slice %92 {offsets = [1, 2, 0, 0], sizes = [4, 4, 8, 32], strides = [1, 1, 1, 1]} : vector<6x6x8x32xf32> to vector<4x4x8x32xf32>
    %129 = vector.shape_cast %128 : vector<4x4x8x32xf32> to vector<2x2x4x8x32xf32>
    %130 = vector.extract_strided_slice %129 {offsets = [0, 0, 0, 0, 0], sizes = [2, 1, 4, 8, 32], strides = [1, 1, 1, 1, 1]} : vector<2x2x4x8x32xf32> to vector<2x1x4x8x32xf32>
    %131 = vector.shape_cast %130 : vector<2x1x4x8x32xf32> to vector<2x4x8x32xf32>
    %132 = vector.shape_cast %131 : vector<2x4x8x32xf32> to vector<2x2x2x8x32xf32>
    %133 = vector.extract_strided_slice %132 {offsets = [0, 0, 0, 0, 0], sizes = [2, 2, 1, 8, 32], strides = [1, 1, 1, 1, 1]} : vector<2x2x2x8x32xf32> to vector<2x2x1x8x32xf32>
    %134 = vector.shape_cast %133 : vector<2x2x1x8x32xf32> to vector<2x2x8x32xf32>
    %135 = vector.extract_strided_slice %92 {offsets = [2, 0, 0, 0], sizes = [4, 4, 8, 32], strides = [1, 1, 1, 1]} : vector<6x6x8x32xf32> to vector<4x4x8x32xf32>
    %136 = vector.shape_cast %135 : vector<4x4x8x32xf32> to vector<2x2x4x8x32xf32>
    %137 = vector.extract_strided_slice %136 {offsets = [0, 0, 0, 0, 0], sizes = [2, 1, 4, 8, 32], strides = [1, 1, 1, 1, 1]} : vector<2x2x4x8x32xf32> to vector<2x1x4x8x32xf32>
    %138 = vector.shape_cast %137 : vector<2x1x4x8x32xf32> to vector<2x4x8x32xf32>
    %139 = vector.shape_cast %138 : vector<2x4x8x32xf32> to vector<2x2x2x8x32xf32>
    %140 = vector.extract_strided_slice %139 {offsets = [0, 0, 0, 0, 0], sizes = [2, 2, 1, 8, 32], strides = [1, 1, 1, 1, 1]} : vector<2x2x2x8x32xf32> to vector<2x2x1x8x32xf32>
    %141 = vector.shape_cast %140 : vector<2x2x1x8x32xf32> to vector<2x2x8x32xf32>
    %142 = vector.extract_strided_slice %92 {offsets = [2, 1, 0, 0], sizes = [4, 4, 8, 32], strides = [1, 1, 1, 1]} : vector<6x6x8x32xf32> to vector<4x4x8x32xf32>
    %143 = vector.shape_cast %142 : vector<4x4x8x32xf32> to vector<2x2x4x8x32xf32>
    %144 = vector.extract_strided_slice %143 {offsets = [0, 0, 0, 0, 0], sizes = [2, 1, 4, 8, 32], strides = [1, 1, 1, 1, 1]} : vector<2x2x4x8x32xf32> to vector<2x1x4x8x32xf32>
    %145 = vector.shape_cast %144 : vector<2x1x4x8x32xf32> to vector<2x4x8x32xf32>
    %146 = vector.shape_cast %145 : vector<2x4x8x32xf32> to vector<2x2x2x8x32xf32>
    %147 = vector.extract_strided_slice %146 {offsets = [0, 0, 0, 0, 0], sizes = [2, 2, 1, 8, 32], strides = [1, 1, 1, 1, 1]} : vector<2x2x2x8x32xf32> to vector<2x2x1x8x32xf32>
    %148 = vector.shape_cast %147 : vector<2x2x1x8x32xf32> to vector<2x2x8x32xf32>
    %149 = vector.extract_strided_slice %92 {offsets = [2, 2, 0, 0], sizes = [4, 4, 8, 32], strides = [1, 1, 1, 1]} : vector<6x6x8x32xf32> to vector<4x4x8x32xf32>
    %150 = vector.shape_cast %149 : vector<4x4x8x32xf32> to vector<2x2x4x8x32xf32>
    %151 = vector.extract_strided_slice %150 {offsets = [0, 0, 0, 0, 0], sizes = [2, 1, 4, 8, 32], strides = [1, 1, 1, 1, 1]} : vector<2x2x4x8x32xf32> to vector<2x1x4x8x32xf32>
    %152 = vector.shape_cast %151 : vector<2x1x4x8x32xf32> to vector<2x4x8x32xf32>
    %153 = vector.shape_cast %152 : vector<2x4x8x32xf32> to vector<2x2x2x8x32xf32>
    %154 = vector.extract_strided_slice %153 {offsets = [0, 0, 0, 0, 0], sizes = [2, 2, 1, 8, 32], strides = [1, 1, 1, 1, 1]} : vector<2x2x2x8x32xf32> to vector<2x2x1x8x32xf32>
    %155 = vector.shape_cast %154 : vector<2x2x1x8x32xf32> to vector<2x2x8x32xf32>
    %156 = tpu.concatenate %99, %106, %113, %120, %127, %134, %141, %148, %155 in 3 : vector<2x2x8x32xf32>, vector<2x2x8x32xf32>, vector<2x2x8x32xf32>, vector<2x2x8x32xf32>, vector<2x2x8x32xf32>, vector<2x2x8x32xf32>, vector<2x2x8x32xf32>, vector<2x2x8x32xf32>, vector<2x2x8x32xf32> -> vector<2x2x8x288xf32>
    %157 = vector.shape_cast %156 : vector<2x2x8x288xf32> to vector<32x288xf32>
    %158 = arith.truncf %157 : vector<32x288xf32> to vector<32x288xbf16>
    %c0_18 = arith.constant 0 : index
    %c0_19 = arith.constant 0 : index
    %159 = vector.load %arg6[%c0_18, %c0_19] : memref<288x64xbf16, #tpu.memory_space<vmem>>, vector<288x64xbf16>
    %cst_20 = arith.constant dense<0.000000e+00> : vector<32x64xf32>
    %160 = tpu.matmul %158, %159, %cst_20 {dimension_numbers = #tpu.dot_dimension_numbers<[1], [0], [0], [1], [0, 0, 1, 1], [], []>} : vector<32x288xbf16>, vector<288x64xbf16>, vector<32x64xf32> -> vector<32x64xf32>
    %c0_21 = arith.constant 0 : index
    %c0_22 = arith.constant 0 : index
    %161 = vector.load %arg7[%c0_21, %c0_22] : memref<1x64xf32, #tpu.memory_space<vmem>>, vector<1x64xf32>
    %162 = vector.broadcast %161 : vector<1x64xf32> to vector<32x64xf32>
    %163 = arith.addf %160, %162 : vector<32x64xf32>
    %cst_23 = arith.constant 0.000000e+00 : f32
    %164 = vector.broadcast %cst_23 : f32 to vector<32x64xf32>
    %165 = arith.maximumf %163, %164 : vector<32x64xf32>
    %166 = vector.shape_cast %165 : vector<32x64xf32> to vector<2x2x8x64xf32>
    %cst_24 = arith.constant 0.000000e+00 : f32
    %167 = vector.broadcast %cst_24 : f32 to vector<1x2x8x64xf32>
    %168 = tpu.concatenate %167, %166, %167 in 0 : vector<1x2x8x64xf32>, vector<2x2x8x64xf32>, vector<1x2x8x64xf32> -> vector<4x2x8x64xf32>
    %cst_25 = arith.constant 0.000000e+00 : f32
    %169 = vector.broadcast %cst_25 : f32 to vector<4x1x8x64xf32>
    %170 = tpu.concatenate %169, %168, %169 in 1 : vector<4x1x8x64xf32>, vector<4x2x8x64xf32>, vector<4x1x8x64xf32> -> vector<4x4x8x64xf32>
    %171 = vector.extract_strided_slice %170 {offsets = [0, 0, 0, 0], sizes = [2, 2, 8, 64], strides = [1, 1, 1, 1]} : vector<4x4x8x64xf32> to vector<2x2x8x64xf32>
    %172 = vector.shape_cast %171 : vector<2x2x8x64xf32> to vector<1x2x2x8x64xf32>
    %173 = vector.extract_strided_slice %172 {offsets = [0, 0, 0, 0, 0], sizes = [1, 1, 2, 8, 64], strides = [1, 1, 1, 1, 1]} : vector<1x2x2x8x64xf32> to vector<1x1x2x8x64xf32>
    %174 = vector.shape_cast %173 : vector<1x1x2x8x64xf32> to vector<1x2x8x64xf32>
    %175 = vector.shape_cast %174 : vector<1x2x8x64xf32> to vector<1x1x2x8x64xf32>
    %176 = vector.extract_strided_slice %175 {offsets = [0, 0, 0, 0, 0], sizes = [1, 1, 1, 8, 64], strides = [1, 1, 1, 1, 1]} : vector<1x1x2x8x64xf32> to vector<1x1x1x8x64xf32>
    %177 = vector.shape_cast %176 : vector<1x1x1x8x64xf32> to vector<1x1x8x64xf32>
    %178 = vector.extract_strided_slice %170 {offsets = [0, 1, 0, 0], sizes = [2, 2, 8, 64], strides = [1, 1, 1, 1]} : vector<4x4x8x64xf32> to vector<2x2x8x64xf32>
    %179 = vector.shape_cast %178 : vector<2x2x8x64xf32> to vector<1x2x2x8x64xf32>
    %180 = vector.extract_strided_slice %179 {offsets = [0, 0, 0, 0, 0], sizes = [1, 1, 2, 8, 64], strides = [1, 1, 1, 1, 1]} : vector<1x2x2x8x64xf32> to vector<1x1x2x8x64xf32>
    %181 = vector.shape_cast %180 : vector<1x1x2x8x64xf32> to vector<1x2x8x64xf32>
    %182 = vector.shape_cast %181 : vector<1x2x8x64xf32> to vector<1x1x2x8x64xf32>
    %183 = vector.extract_strided_slice %182 {offsets = [0, 0, 0, 0, 0], sizes = [1, 1, 1, 8, 64], strides = [1, 1, 1, 1, 1]} : vector<1x1x2x8x64xf32> to vector<1x1x1x8x64xf32>
    %184 = vector.shape_cast %183 : vector<1x1x1x8x64xf32> to vector<1x1x8x64xf32>
    %185 = vector.extract_strided_slice %170 {offsets = [0, 2, 0, 0], sizes = [2, 2, 8, 64], strides = [1, 1, 1, 1]} : vector<4x4x8x64xf32> to vector<2x2x8x64xf32>
    %186 = vector.shape_cast %185 : vector<2x2x8x64xf32> to vector<1x2x2x8x64xf32>
    %187 = vector.extract_strided_slice %186 {offsets = [0, 0, 0, 0, 0], sizes = [1, 1, 2, 8, 64], strides = [1, 1, 1, 1, 1]} : vector<1x2x2x8x64xf32> to vector<1x1x2x8x64xf32>
    %188 = vector.shape_cast %187 : vector<1x1x2x8x64xf32> to vector<1x2x8x64xf32>
    %189 = vector.shape_cast %188 : vector<1x2x8x64xf32> to vector<1x1x2x8x64xf32>
    %190 = vector.extract_strided_slice %189 {offsets = [0, 0, 0, 0, 0], sizes = [1, 1, 1, 8, 64], strides = [1, 1, 1, 1, 1]} : vector<1x1x2x8x64xf32> to vector<1x1x1x8x64xf32>
    %191 = vector.shape_cast %190 : vector<1x1x1x8x64xf32> to vector<1x1x8x64xf32>
    %192 = vector.extract_strided_slice %170 {offsets = [1, 0, 0, 0], sizes = [2, 2, 8, 64], strides = [1, 1, 1, 1]} : vector<4x4x8x64xf32> to vector<2x2x8x64xf32>
    %193 = vector.shape_cast %192 : vector<2x2x8x64xf32> to vector<1x2x2x8x64xf32>
    %194 = vector.extract_strided_slice %193 {offsets = [0, 0, 0, 0, 0], sizes = [1, 1, 2, 8, 64], strides = [1, 1, 1, 1, 1]} : vector<1x2x2x8x64xf32> to vector<1x1x2x8x64xf32>
    %195 = vector.shape_cast %194 : vector<1x1x2x8x64xf32> to vector<1x2x8x64xf32>
    %196 = vector.shape_cast %195 : vector<1x2x8x64xf32> to vector<1x1x2x8x64xf32>
    %197 = vector.extract_strided_slice %196 {offsets = [0, 0, 0, 0, 0], sizes = [1, 1, 1, 8, 64], strides = [1, 1, 1, 1, 1]} : vector<1x1x2x8x64xf32> to vector<1x1x1x8x64xf32>
    %198 = vector.shape_cast %197 : vector<1x1x1x8x64xf32> to vector<1x1x8x64xf32>
    %199 = vector.extract_strided_slice %170 {offsets = [1, 1, 0, 0], sizes = [2, 2, 8, 64], strides = [1, 1, 1, 1]} : vector<4x4x8x64xf32> to vector<2x2x8x64xf32>
    %200 = vector.shape_cast %199 : vector<2x2x8x64xf32> to vector<1x2x2x8x64xf32>
    %201 = vector.extract_strided_slice %200 {offsets = [0, 0, 0, 0, 0], sizes = [1, 1, 2, 8, 64], strides = [1, 1, 1, 1, 1]} : vector<1x2x2x8x64xf32> to vector<1x1x2x8x64xf32>
    %202 = vector.shape_cast %201 : vector<1x1x2x8x64xf32> to vector<1x2x8x64xf32>
    %203 = vector.shape_cast %202 : vector<1x2x8x64xf32> to vector<1x1x2x8x64xf32>
    %204 = vector.extract_strided_slice %203 {offsets = [0, 0, 0, 0, 0], sizes = [1, 1, 1, 8, 64], strides = [1, 1, 1, 1, 1]} : vector<1x1x2x8x64xf32> to vector<1x1x1x8x64xf32>
    %205 = vector.shape_cast %204 : vector<1x1x1x8x64xf32> to vector<1x1x8x64xf32>
    %206 = vector.extract_strided_slice %170 {offsets = [1, 2, 0, 0], sizes = [2, 2, 8, 64], strides = [1, 1, 1, 1]} : vector<4x4x8x64xf32> to vector<2x2x8x64xf32>
    %207 = vector.shape_cast %206 : vector<2x2x8x64xf32> to vector<1x2x2x8x64xf32>
    %208 = vector.extract_strided_slice %207 {offsets = [0, 0, 0, 0, 0], sizes = [1, 1, 2, 8, 64], strides = [1, 1, 1, 1, 1]} : vector<1x2x2x8x64xf32> to vector<1x1x2x8x64xf32>
    %209 = vector.shape_cast %208 : vector<1x1x2x8x64xf32> to vector<1x2x8x64xf32>
    %210 = vector.shape_cast %209 : vector<1x2x8x64xf32> to vector<1x1x2x8x64xf32>
    %211 = vector.extract_strided_slice %210 {offsets = [0, 0, 0, 0, 0], sizes = [1, 1, 1, 8, 64], strides = [1, 1, 1, 1, 1]} : vector<1x1x2x8x64xf32> to vector<1x1x1x8x64xf32>
    %212 = vector.shape_cast %211 : vector<1x1x1x8x64xf32> to vector<1x1x8x64xf32>
    %213 = vector.extract_strided_slice %170 {offsets = [2, 0, 0, 0], sizes = [2, 2, 8, 64], strides = [1, 1, 1, 1]} : vector<4x4x8x64xf32> to vector<2x2x8x64xf32>
    %214 = vector.shape_cast %213 : vector<2x2x8x64xf32> to vector<1x2x2x8x64xf32>
    %215 = vector.extract_strided_slice %214 {offsets = [0, 0, 0, 0, 0], sizes = [1, 1, 2, 8, 64], strides = [1, 1, 1, 1, 1]} : vector<1x2x2x8x64xf32> to vector<1x1x2x8x64xf32>
    %216 = vector.shape_cast %215 : vector<1x1x2x8x64xf32> to vector<1x2x8x64xf32>
    %217 = vector.shape_cast %216 : vector<1x2x8x64xf32> to vector<1x1x2x8x64xf32>
    %218 = vector.extract_strided_slice %217 {offsets = [0, 0, 0, 0, 0], sizes = [1, 1, 1, 8, 64], strides = [1, 1, 1, 1, 1]} : vector<1x1x2x8x64xf32> to vector<1x1x1x8x64xf32>
    %219 = vector.shape_cast %218 : vector<1x1x1x8x64xf32> to vector<1x1x8x64xf32>
    %220 = vector.extract_strided_slice %170 {offsets = [2, 1, 0, 0], sizes = [2, 2, 8, 64], strides = [1, 1, 1, 1]} : vector<4x4x8x64xf32> to vector<2x2x8x64xf32>
    %221 = vector.shape_cast %220 : vector<2x2x8x64xf32> to vector<1x2x2x8x64xf32>
    %222 = vector.extract_strided_slice %221 {offsets = [0, 0, 0, 0, 0], sizes = [1, 1, 2, 8, 64], strides = [1, 1, 1, 1, 1]} : vector<1x2x2x8x64xf32> to vector<1x1x2x8x64xf32>
    %223 = vector.shape_cast %222 : vector<1x1x2x8x64xf32> to vector<1x2x8x64xf32>
    %224 = vector.shape_cast %223 : vector<1x2x8x64xf32> to vector<1x1x2x8x64xf32>
    %225 = vector.extract_strided_slice %224 {offsets = [0, 0, 0, 0, 0], sizes = [1, 1, 1, 8, 64], strides = [1, 1, 1, 1, 1]} : vector<1x1x2x8x64xf32> to vector<1x1x1x8x64xf32>
    %226 = vector.shape_cast %225 : vector<1x1x1x8x64xf32> to vector<1x1x8x64xf32>
    %227 = vector.extract_strided_slice %170 {offsets = [2, 2, 0, 0], sizes = [2, 2, 8, 64], strides = [1, 1, 1, 1]} : vector<4x4x8x64xf32> to vector<2x2x8x64xf32>
    %228 = vector.shape_cast %227 : vector<2x2x8x64xf32> to vector<1x2x2x8x64xf32>
    %229 = vector.extract_strided_slice %228 {offsets = [0, 0, 0, 0, 0], sizes = [1, 1, 2, 8, 64], strides = [1, 1, 1, 1, 1]} : vector<1x2x2x8x64xf32> to vector<1x1x2x8x64xf32>
    %230 = vector.shape_cast %229 : vector<1x1x2x8x64xf32> to vector<1x2x8x64xf32>
    %231 = vector.shape_cast %230 : vector<1x2x8x64xf32> to vector<1x1x2x8x64xf32>
    %232 = vector.extract_strided_slice %231 {offsets = [0, 0, 0, 0, 0], sizes = [1, 1, 1, 8, 64], strides = [1, 1, 1, 1, 1]} : vector<1x1x2x8x64xf32> to vector<1x1x1x8x64xf32>
    %233 = vector.shape_cast %232 : vector<1x1x1x8x64xf32> to vector<1x1x8x64xf32>
    %234 = tpu.concatenate %177, %184, %191, %198, %205, %212, %219, %226, %233 in 3 : vector<1x1x8x64xf32>, vector<1x1x8x64xf32>, vector<1x1x8x64xf32>, vector<1x1x8x64xf32>, vector<1x1x8x64xf32>, vector<1x1x8x64xf32>, vector<1x1x8x64xf32>, vector<1x1x8x64xf32>, vector<1x1x8x64xf32> -> vector<1x1x8x576xf32>
    %235 = vector.shape_cast %234 : vector<1x1x8x576xf32> to vector<8x576xf32>
    %236 = arith.truncf %235 : vector<8x576xf32> to vector<8x576xbf16>
    %c0_26 = arith.constant 0 : index
    %c0_27 = arith.constant 0 : index
    %237 = vector.load %arg8[%c0_26, %c0_27] : memref<576x128xbf16, #tpu.memory_space<vmem>>, vector<576x128xbf16>
    %cst_28 = arith.constant dense<0.000000e+00> : vector<8x128xf32>
    %238 = tpu.matmul %236, %237, %cst_28 {dimension_numbers = #tpu.dot_dimension_numbers<[1], [0], [0], [1], [0, 0, 1, 1], [], []>} : vector<8x576xbf16>, vector<576x128xbf16>, vector<8x128xf32> -> vector<8x128xf32>
    %c0_29 = arith.constant 0 : index
    %c0_30 = arith.constant 0 : index
    %239 = vector.load %arg9[%c0_29, %c0_30] : memref<1x128xf32, #tpu.memory_space<vmem>>, vector<1x128xf32>
    %240 = vector.broadcast %239 : vector<1x128xf32> to vector<8x128xf32>
    %241 = arith.addf %238, %240 : vector<8x128xf32>
    %cst_31 = arith.constant 0.000000e+00 : f32
    %242 = vector.broadcast %cst_31 : f32 to vector<8x128xf32>
    %243 = arith.maximumf %241, %242 : vector<8x128xf32>
    %244 = vector.shape_cast %243 : vector<8x128xf32> to vector<1x1x8x128xf32>
    %cst_32 = arith.constant dense<0.000000e+00> : vector<8x128xf32>
    %245 = vector.multi_reduction <add>, %244, %cst_32 [0, 1] : vector<1x1x8x128xf32> to vector<8x128xf32>
    %cst_33 = arith.constant 1.000000e+00 : f32
    %246 = vector.broadcast %cst_33 : f32 to vector<8x128xf32>
    %247 = arith.divf %245, %246 : vector<8x128xf32>
    %248 = arith.truncf %247 : vector<8x128xf32> to vector<8x128xbf16>
    %c0_34 = arith.constant 0 : index
    %c0_35 = arith.constant 0 : index
    %249 = vector.load %arg10[%c0_34, %c0_35] : memref<128x128xbf16, #tpu.memory_space<vmem>>, vector<128x128xbf16>
    %cst_36 = arith.constant dense<0.000000e+00> : vector<8x128xf32>
    %250 = tpu.matmul %248, %249, %cst_36 {dimension_numbers = #tpu.dot_dimension_numbers<[1], [0], [0], [1], [0, 0, 1, 1], [], []>} : vector<8x128xbf16>, vector<128x128xbf16>, vector<8x128xf32> -> vector<8x128xf32>
    %c0_37 = arith.constant 0 : index
    %c0_38 = arith.constant 0 : index
    %251 = vector.load %arg11[%c0_37, %c0_38] : memref<1x128xf32, #tpu.memory_space<vmem>>, vector<1x128xf32>
    %252 = vector.broadcast %251 : vector<1x128xf32> to vector<8x128xf32>
    %253 = arith.addf %250, %252 : vector<8x128xf32>
    %c0_39 = arith.constant 0 : index
    %c0_40 = arith.constant 0 : index
    %254 = vector.load %arg12[%c0_39, %c0_40] : memref<8x128xf32, #tpu.memory_space<vmem>>, vector<8x128xf32>
    tpu.vector_store %arg12[%c0_39, %c0_40], %253 {strides = array<i32>} : memref<8x128xf32, #tpu.memory_space<vmem>>, vector<8x128xf32>,
    return
  }
  func.func @transform_0(%arg0: i32) -> (i32, i32, i32, i32) {
    %c0_i32 = arith.constant 0 : i32
    %c0_i32_0 = arith.constant 0 : i32
    %c0_i32_1 = arith.constant 0 : i32
    %c0_i32_2 = arith.constant 0 : i32
    return %c0_i32, %c0_i32_0, %arg0, %c0_i32_1 : i32, i32, i32, i32
  }
  func.func @transform_1(%arg0: i32) -> (i32, i32) {
    %c0_i32 = arith.constant 0 : i32
    %c0_i32_0 = arith.constant 0 : i32
    %c0_i32_1 = arith.constant 0 : i32
    return %c0_i32, %c0_i32_0 : i32, i32
  }
  func.func @transform_2(%arg0: i32) -> (i32, i32) {
    %c0_i32 = arith.constant 0 : i32
    %c0_i32_0 = arith.constant 0 : i32
    %c0_i32_1 = arith.constant 0 : i32
    return %c0_i32, %c0_i32_0 : i32, i32
  }
  func.func @transform_3(%arg0: i32) -> (i32, i32) {
    %c0_i32 = arith.constant 0 : i32
    %c0_i32_0 = arith.constant 0 : i32
    %c0_i32_1 = arith.constant 0 : i32
    return %c0_i32, %c0_i32_0 : i32, i32
  }
  func.func @transform_4(%arg0: i32) -> (i32, i32) {
    %c0_i32 = arith.constant 0 : i32
    %c0_i32_0 = arith.constant 0 : i32
    %c0_i32_1 = arith.constant 0 : i32
    return %c0_i32, %c0_i32_0 : i32, i32
  }
  func.func @transform_5(%arg0: i32) -> (i32, i32) {
    %c0_i32 = arith.constant 0 : i32
    %c0_i32_0 = arith.constant 0 : i32
    %c0_i32_1 = arith.constant 0 : i32
    return %c0_i32, %c0_i32_0 : i32, i32
  }
  func.func @transform_6(%arg0: i32) -> (i32, i32) {
    %c0_i32 = arith.constant 0 : i32
    %c0_i32_0 = arith.constant 0 : i32
    %c0_i32_1 = arith.constant 0 : i32
    return %c0_i32, %c0_i32_0 : i32, i32
  }
  func.func @transform_7(%arg0: i32) -> (i32, i32) {
    %c0_i32 = arith.constant 0 : i32
    %c0_i32_0 = arith.constant 0 : i32
    %c0_i32_1 = arith.constant 0 : i32
    return %c0_i32, %c0_i32_0 : i32, i32
  }
  func.func @transform_8(%arg0: i32) -> (i32, i32) {
    %c0_i32 = arith.constant 0 : i32
    %c0_i32_0 = arith.constant 0 : i32
    %c0_i32_1 = arith.constant 0 : i32
    return %c0_i32, %c0_i32_0 : i32, i32
  }
  func.func @transform_9(%arg0: i32) -> (i32, i32) {
    %c0_i32 = arith.constant 0 : i32
    %c0_i32_0 = arith.constant 0 : i32
    %c0_i32_1 = arith.constant 0 : i32
    return %c0_i32, %c0_i32_0 : i32, i32
  }
  func.func @transform_10(%arg0: i32) -> (i32, i32) {
    %c0_i32 = arith.constant 0 : i32
    %c0_i32_0 = arith.constant 0 : i32
    %c0_i32_1 = arith.constant 0 : i32
    return %c0_i32, %c0_i32_0 : i32, i32
  }
  func.func @transform_11(%arg0: i32) -> (i32, i32) {
    %c0_i32 = arith.constant 0 : i32
    %c0_i32_0 = arith.constant 0 : i32
    return %arg0, %c0_i32 : i32, i32
  }
}

</mosaic_0001>

<bundles_post_ra>
// kernel: forward_pallas.1
= control target key start
LH: loop header
LB: loop body
LE: loop exit
PB: predicated region body
PF: predicated region fallthrough
CT: control target
= control target key end

     0   :  { %s4963_s0 = inlined_call_operand.vmem [shape: f32[8,8,16,27], index: 0, kind: input, shape index: {}]   ;;  %s4964_s1 = inlined_call_operand.vmem [shape: bf16[27,16], index: 1, kind: input, shape index: {}]   ;;  %s4965_s2 = inlined_call_operand.vmem [shape: f32[1,16], index: 2, kind: input, shape index: {}]   ;;  %s4966_s3 = inlined_call_operand.vmem [shape: bf16[144,32], index: 3, kind: input, shape index: {}]   ;;  %s4967_s4 = inlined_call_operand.vmem [shape: f32[1,32], index: 4, kind: input, shape index: {}]   ;;  %s4968_s5 = inlined_call_operand.vmem [shape: bf16[288,64], index: 5, kind: input, shape index: {}]   ;;  %s4969_s6 = inlined_call_operand.vmem [shape: f32[1,64], index: 6, kind: input, shape index: {}]   ;;  %s4970_s7 = inlined_call_operand.vmem [shape: bf16[576,128], index: 7, kind: input, shape index: {}]   ;;  %s4971_s8 = inlined_call_operand.vmem [shape: f32[1,128], index: 8, kind: input, shape index: {}]   ;;  %s4972_s9 = inlined_call_operand.vmem [shape: bf16[128,128], index: 9, kind: input, shape index: {}]   ;;  %s4973_s10 = inlined_call_operand.vmem [shape: f32[1,128], index: 10, kind: input, shape index: {}]   ;;  %s4974_s11 = inlined_call_operand.hbm [shape: f32[16,128], index: 11, kind: output, shape index: {}]  }
   0x1   :  { %4982 = sst [smem:[#allocation6_spill]] %s4963_s0 }
   0x2   :  { %4983 = sst [smem:[#allocation7_spill]] %s4964_s1 }
   0x3   :  { %4984 = sst [smem:[#allocation8_spill]] %s4965_s2 }
   0x4   :  { %16 = vsyncpa [#allocation4], 0 }
   0x5   :  { %18 = vsyncpa [#allocation4 + $0x1], 0  ;;  %s3848_s17 = smov 0   ;;  %s3850_s18 = smov 0  }
   0x6   :  { %s3852_s19 = smov 0   ;;  %s3854_s20 = smov 0  }
   0x7 LB: > { %s4975_s21 = sadd.s32 4294967295, %s3774_s20   ;;  %s2929_s22 = sadd.s32 4294967294, %s3774_s20   ;;  %s3774_s20 = sphi %s3854_s20, %s4999_s20   ;;  %s3770_s19 = sphi %s3852_s19, %s4998_s19   ;;  %s3766_s18 = sphi %s3850_s18, %s4997_s18   ;;  %s3762_s17 = sphi %s3848_s17, %s4996_s17  }
   0x8   : > { %s3871_s23 = sadd.s32 1, %s3774_s20   ;;  %s31_s24 = sadd.s32 1, %s3770_s19 }
   0x9   : > { %s28_s25 = ssub.s32 %s3774_s20, %s3871_s23  ;;  %p38_p0 = scmp.ne.s32.totalorder %s3770_s19, %s3766_s18 }
   0xa   : > { %p29_p1 = scmp.eq.s32.totalorder %s28_s25, 0  ;;  %p39_p2 = scmp.eq.s32.totalorder %s3774_s20, 0 }
   0xb   : > { %p278_p3 = scmp.eq.s32.totalorder %s4975_s21, 1  ;;  %p283_p4 = scmp.ne.s32.totalorder %s3766_s18, %s3762_s17 }
   0xc   : > { %s3884_s26 = scalar_select %p29_p1, %s3770_s19, %s31_s24  }
   0xd   : > { %p40_p5 = por %p39_p2, %p38_p0  ;;  %p3886_p6 = por %p278_p3, %p38_p0 }
   0xe   : > { %p284_p7 = scmp.eq.s32.totalorder %s2929_s22, 1  ;;  %p2931_p9 = scmp.ge.s32.totalorder %s3774_s20, 2 }
  0x10   : > { %p3890_p8 = por %p284_p7, %p283_p4  ;;  %330 = sbr.rel (%p2931_p9) target bundleno = 65 (0x41), region = 56 }
  0x17   : > { %333 = sbr.rel (!%p40_p5) target bundleno = 65 (0x41), region = 60  ;;  %s335_s29 = sand.u32 (%p40_p5), 1, %s3770_s19  }
  0x18   : > { %s2933_s30 = sshll.u32 (%p40_p5), %s3774_s20, 3  ;;  %s2932_s12 = sshll.u32 (%p40_p5), %s335_s29, 9 }
  0x19   : > { %s4987_s0 = sld [smem:[#allocation6_spill]] (%p40_p5)  ;;  %s3907_s16 = scalar_lea.vmem (%p40_p5), [#allocation2], %s2932_s12 }
  0x1f   : > { %s3902_s15 = scalar_lea.vmem %s4987_s0, %s2933_s30 }
  0x20   : > { %v493_v0 = vld [vmem:[%s3902_s15] sm:$0xff]  ;;  %v495_v1 = vld [vmem:[%s3902_s15 + $0x10] sm:$0xff] }
  0x21   : > { %v497_v2 = vld [vmem:[%s3902_s15 + $0x20] sm:$0xff]  ;;  %494 = vst [vmem:[%s3907_s16] sm:$0xff] %v493_v0  ;;  %496 = vst [vmem:[%s3907_s16 + $0x8] sm:$0xff] %v495_v1  ;;  %v499_v3 = vld [vmem:[%s3902_s15 + $0x30] sm:$0xff] }
  0x22   : > { %498 = vst [vmem:[%s3907_s16 + $0x10] sm:$0xff] %v497_v2  ;;  %v501_v4 = vld [vmem:[%s3902_s15 + $0x40] sm:$0xff]  ;;  %v503_v5 = vld [vmem:[%s3902_s15 + $0x50] sm:$0xff]  ;;  %500 = vst [vmem:[%s3907_s16 + $0x18] sm:$0xff] %v499_v3 }
  0x23   : > { %502 = vst [vmem:[%s3907_s16 + $0x20] sm:$0xff] %v501_v4  ;;  %504 = vst [vmem:[%s3907_s16 + $0x28] sm:$0xff] %v503_v5  ;;  %v505_v6 = vld [vmem:[%s3902_s15 + $0x60] sm:$0xff]  ;;  %v507_v7 = vld [vmem:[%s3902_s15 + $0x70] sm:$0xff] }
  0x24   : > { %v509_v8 = vld [vmem:[%s3902_s15 + $0x80] sm:$0xff]  ;;  %506 = vst [vmem:[%s3907_s16 + $0x30] sm:$0xff] %v505_v6  ;;  %508 = vst [vmem:[%s3907_s16 + $0x38] sm:$0xff] %v507_v7  ;;  %v511_v9 = vld [vmem:[%s3902_s15 + $0x90] sm:$0xff] }
  0x25   : > { %510 = vst [vmem:[%s3907_s16 + $0x40] sm:$0xff] %v509_v8  ;;  %v513_v10 = vld [vmem:[%s3902_s15 + $0xa0] sm:$0xff]  ;;  %v515_v11 = vld [vmem:[%s3902_s15 + $0xb0] sm:$0xff]  ;;  %512 = vst [vmem:[%s3907_s16 + $0x48] sm:$0xff] %v511_v9 }
  0x26   : > { %514 = vst [vmem:[%s3907_s16 + $0x50] sm:$0xff] %v513_v10  ;;  %516 = vst [vmem:[%s3907_s16 + $0x58] sm:$0xff] %v515_v11  ;;  %v517_v12 = vld [vmem:[%s3902_s15 + $0xc0] sm:$0xff]  ;;  %v519_v13 = vld [vmem:[%s3902_s15 + $0xd0] sm:$0xff] }
  0x27   : > { %v521_v14 = vld [vmem:[%s3902_s15 + $0xe0] sm:$0xff]  ;;  %518 = vst [vmem:[%s3907_s16 + $0x60] sm:$0xff] %v517_v12  ;;  %520 = vst [vmem:[%s3907_s16 + $0x68] sm:$0xff] %v519_v13  ;;  %v523_v15 = vld [vmem:[%s3902_s15 + $0xf0] sm:$0xff] }
  0x28   : > { %522 = vst [vmem:[%s3907_s16 + $0x70] sm:$0xff] %v521_v14  ;;  %v525_v16 = vld [vmem:[%s3902_s15 + $0x100] sm:$0xff]  ;;  %v527_v17 = vld [vmem:[%s3902_s15 + $0x110] sm:$0xff]  ;;  %524 = vst [vmem:[%s3907_s16 + $0x78] sm:$0xff] %v523_v15 }
  0x29   : > { %526 = vst [vmem:[%s3907_s16 + $0x80] sm:$0xff] %v525_v16  ;;  %528 = vst [vmem:[%s3907_s16 + $0x88] sm:$0xff] %v527_v17  ;;  %v529_v18 = vld [vmem:[%s3902_s15 + $0x120] sm:$0xff]  ;;  %v531_v19 = vld [vmem:[%s3902_s15 + $0x130] sm:$0xff] }
  0x2a   : > { %v533_v20 = vld [vmem:[%s3902_s15 + $0x140] sm:$0xff]  ;;  %530 = vst [vmem:[%s3907_s16 + $0x90] sm:$0xff] %v529_v18  ;;  %532 = vst [vmem:[%s3907_s16 + $0x98] sm:$0xff] %v531_v19  ;;  %v535_v21 = vld [vmem:[%s3902_s15 + $0x150] sm:$0xff] }
  0x2b   : > { %534 = vst [vmem:[%s3907_s16 + $0xa0] sm:$0xff] %v533_v20  ;;  %v537_v22 = vld [vmem:[%s3902_s15 + $0x160] sm:$0xff]  ;;  %v539_v23 = vld [vmem:[%s3902_s15 + $0x170] sm:$0xff]  ;;  %536 = vst [vmem:[%s3907_s16 + $0xa8] sm:$0xff] %v535_v21 }
  0x2c   : > { %538 = vst [vmem:[%s3907_s16 + $0xb0] sm:$0xff] %v537_v22  ;;  %540 = vst [vmem:[%s3907_s16 + $0xb8] sm:$0xff] %v539_v23  ;;  %v541_v24 = vld [vmem:[%s3902_s15 + $0x180] sm:$0xff]  ;;  %v543_v25 = vld [vmem:[%s3902_s15 + $0x190] sm:$0xff] }
  0x2d   : > { %v545_v26 = vld [vmem:[%s3902_s15 + $0x1a0] sm:$0xff]  ;;  %542 = vst [vmem:[%s3907_s16 + $0xc0] sm:$0xff] %v541_v24  ;;  %544 = vst [vmem:[%s3907_s16 + $0xc8] sm:$0xff] %v543_v25  ;;  %v547_v27 = vld [vmem:[%s3902_s15 + $0x1b0] sm:$0xff] }
  0x2e   : > { %546 = vst [vmem:[%s3907_s16 + $0xd0] sm:$0xff] %v545_v26  ;;  %v549_v28 = vld [vmem:[%s3902_s15 + $0x1c0] sm:$0xff]  ;;  %v551_v29 = vld [vmem:[%s3902_s15 + $0x1d0] sm:$0xff]  ;;  %548 = vst [vmem:[%s3907_s16 + $0xd8] sm:$0xff] %v547_v27 }
  0x2f   : > { %550 = vst [vmem:[%s3907_s16 + $0xe0] sm:$0xff] %v549_v28  ;;  %552 = vst [vmem:[%s3907_s16 + $0xe8] sm:$0xff] %v551_v29  ;;  %v553_v30 = vld [vmem:[%s3902_s15 + $0x1e0] sm:$0xff]  ;;  %v555_v31 = vld [vmem:[%s3902_s15 + $0x1f0] sm:$0xff] }
  0x30   : > { %v557_v32 = vld [vmem:[%s3902_s15 + $0x200] sm:$0xff]  ;;  %554 = vst [vmem:[%s3907_s16 + $0xf0] sm:$0xff] %v553_v30  ;;  %556 = vst [vmem:[%s3907_s16 + $0xf8] sm:$0xff] %v555_v31  ;;  %v559_v33 = vld [vmem:[%s3902_s15 + $0x210] sm:$0xff] }
  0x31   : > { %558 = vst [vmem:[%s3907_s16 + $0x100] sm:$0xff] %v557_v32  ;;  %v561_v34 = vld [vmem:[%s3902_s15 + $0x220] sm:$0xff]  ;;  %v563_v35 = vld [vmem:[%s3902_s15 + $0x230] sm:$0xff]  ;;  %560 = vst [vmem:[%s3907_s16 + $0x108] sm:$0xff] %v559_v33 }
  0x32   : > { %562 = vst [vmem:[%s3907_s16 + $0x110] sm:$0xff] %v561_v34  ;;  %564 = vst [vmem:[%s3907_s16 + $0x118] sm:$0xff] %v563_v35  ;;  %v565_v36 = vld [vmem:[%s3902_s15 + $0x240] sm:$0xff]  ;;  %v567_v37 = vld [vmem:[%s3902_s15 + $0x250] sm:$0xff] }
  0x33   : > { %v569_v38 = vld [vmem:[%s3902_s15 + $0x260] sm:$0xff]  ;;  %566 = vst [vmem:[%s3907_s16 + $0x120] sm:$0xff] %v565_v36  ;;  %568 = vst [vmem:[%s3907_s16 + $0x128] sm:$0xff] %v567_v37  ;;  %v571_v39 = vld [vmem:[%s3902_s15 + $0x270] sm:$0xff] }
  0x34   : > { %570 = vst [vmem:[%s3907_s16 + $0x130] sm:$0xff] %v569_v38  ;;  %v573_v40 = vld [vmem:[%s3902_s15 + $0x280] sm:$0xff]  ;;  %v575_v41 = vld [vmem:[%s3902_s15 + $0x290] sm:$0xff]  ;;  %572 = vst [vmem:[%s3907_s16 + $0x138] sm:$0xff] %v571_v39 }
  0x35   : > { %574 = vst [vmem:[%s3907_s16 + $0x140] sm:$0xff] %v573_v40  ;;  %576 = vst [vmem:[%s3907_s16 + $0x148] sm:$0xff] %v575_v41  ;;  %v577_v42 = vld [vmem:[%s3902_s15 + $0x2a0] sm:$0xff]  ;;  %v579_v43 = vld [vmem:[%s3902_s15 + $0x2b0] sm:$0xff] }
  0x36   : > { %v581_v44 = vld [vmem:[%s3902_s15 + $0x2c0] sm:$0xff]  ;;  %578 = vst [vmem:[%s3907_s16 + $0x150] sm:$0xff] %v577_v42  ;;  %580 = vst [vmem:[%s3907_s16 + $0x158] sm:$0xff] %v579_v43  ;;  %v583_v45 = vld [vmem:[%s3902_s15 + $0x2d0] sm:$0xff] }
  0x37   : > { %582 = vst [vmem:[%s3907_s16 + $0x160] sm:$0xff] %v581_v44  ;;  %v585_v46 = vld [vmem:[%s3902_s15 + $0x2e0] sm:$0xff]  ;;  %v587_v47 = vld [vmem:[%s3902_s15 + $0x2f0] sm:$0xff]  ;;  %584 = vst [vmem:[%s3907_s16 + $0x168] sm:$0xff] %v583_v45 }
  0x38   : > { %586 = vst [vmem:[%s3907_s16 + $0x170] sm:$0xff] %v585_v46  ;;  %588 = vst [vmem:[%s3907_s16 + $0x178] sm:$0xff] %v587_v47  ;;  %v589_v48 = vld [vmem:[%s3902_s15 + $0x300] sm:$0xff]  ;;  %v591_v49 = vld [vmem:[%s3902_s15 + $0x310] sm:$0xff] }
  0x39   : > { %v593_v50 = vld [vmem:[%s3902_s15 + $0x320] sm:$0xff]  ;;  %590 = vst [vmem:[%s3907_s16 + $0x180] sm:$0xff] %v589_v48  ;;  %592 = vst [vmem:[%s3907_s16 + $0x188] sm:$0xff] %v591_v49  ;;  %v595_v51 = vld [vmem:[%s3902_s15 + $0x330] sm:$0xff] }
  0x3a   : > { %594 = vst [vmem:[%s3907_s16 + $0x190] sm:$0xff] %v593_v50  ;;  %v597_v52 = vld [vmem:[%s3902_s15 + $0x340] sm:$0xff]  ;;  %v599_v53 = vld [vmem:[%s3902_s15 + $0x350] sm:$0xff]  ;;  %596 = vst [vmem:[%s3907_s16 + $0x198] sm:$0xff] %v595_v51 }
  0x3b   : > { %598 = vst [vmem:[%s3907_s16 + $0x1a0] sm:$0xff] %v597_v52  ;;  %600 = vst [vmem:[%s3907_s16 + $0x1a8] sm:$0xff] %v599_v53  ;;  %v601_v54 = vld [vmem:[%s3902_s15 + $0x360] sm:$0xff]  ;;  %v603_v55 = vld [vmem:[%s3902_s15 + $0x370] sm:$0xff] }
  0x3c   : > { %v605_v56 = vld [vmem:[%s3902_s15 + $0x380] sm:$0xff]  ;;  %602 = vst [vmem:[%s3907_s16 + $0x1b0] sm:$0xff] %v601_v54  ;;  %604 = vst [vmem:[%s3907_s16 + $0x1b8] sm:$0xff] %v603_v55  ;;  %v607_v57 = vld [vmem:[%s3902_s15 + $0x390] sm:$0xff] }
  0x3d   : > { %606 = vst [vmem:[%s3907_s16 + $0x1c0] sm:$0xff] %v605_v56  ;;  %v609_v58 = vld [vmem:[%s3902_s15 + $0x3a0] sm:$0xff]  ;;  %v611_v59 = vld [vmem:[%s3902_s15 + $0x3b0] sm:$0xff]  ;;  %608 = vst [vmem:[%s3907_s16 + $0x1c8] sm:$0xff] %v607_v57 }
  0x3e   : > { %610 = vst [vmem:[%s3907_s16 + $0x1d0] sm:$0xff] %v609_v58  ;;  %612 = vst [vmem:[%s3907_s16 + $0x1d8] sm:$0xff] %v611_v59  ;;  %v613_v60 = vld [vmem:[%s3902_s15 + $0x3c0] sm:$0xff]  ;;  %v615_v61 = vld [vmem:[%s3902_s15 + $0x3d0] sm:$0xff] }
  0x3f   : > { %v617_v62 = vld [vmem:[%s3902_s15 + $0x3e0] sm:$0xff]  ;;  %614 = vst [vmem:[%s3907_s16 + $0x1e0] sm:$0xff] %v613_v60  ;;  %616 = vst [vmem:[%s3907_s16 + $0x1e8] sm:$0xff] %v615_v61  ;;  %v619_v63 = vld [vmem:[%s3902_s15 + $0x3f0] sm:$0xff] }
  0x40   : > { %618 = vst [vmem:[%s3907_s16 + $0x1f0] sm:$0xff] %v617_v62  ;;  %620 = vst [vmem:[%s3907_s16 + $0x1f8] sm:$0xff] %v619_v63 }
  0x41 PF: > { %p2934_p10 = scmp.ge.s32.totalorder %s3774_s20, 1  ;;  %p625_p11 = scmp.lt.s32.totalorder %s3774_s20, 3 }
  0x43   : > { %p626_p12 = pnand %p2934_p10, %p625_p11 }
  0x44   : > { %s4988_s1 = sld [smem:[#allocation7_spill]] (!%p626_p12)  ;;  %vm887_vm0 = vcmask (!%p626_p12), 1044480   ;;  %vm888_vm1 = vcmask (!%p626_p12), 1045504   ;;  %s4043_s30 = sand.u32 (!%p626_p12), 1, %s3766_s18   ;;  %v3776_v2 = vmov (!%p626_p12), 65535   ;;  %vm790_vm2 = vcmask (!%p626_p12), 220160  }
  0x45   : > { %629 = sbr.rel (%p626_p12) target bundleno = 1685 (0x695), region = 98  ;;  %v889_v3 = vsel (!%p626_p12), %vm887_vm0, 4294967295, %v3776_v2  ;;  %s2935_s12 = sshll.u32 (!%p626_p12), %s4043_s30, 9  ;;  %vm1611_vm3 = vcmask (!%p626_p12), 130048   ;;  %vm1625_vm4 = vcmask (!%p626_p12), 261120   ;;  %vm1639_vm5 = vcmask (!%p626_p12), 392192  }
  0x46   : > { %v890_v4 = vsel (!%p626_p12), %vm888_vm1, %v889_v3, 0  ;;  %s4046_s13 = scalar_lea.vmem (!%p626_p12), [#allocation2], %s2935_s12  ;;  %s4989_s2 = sld [smem:[#allocation8_spill]] (!%p626_p12)  ;;  %vm1656_vm6 = vcmask (!%p626_p12), 523264   ;;  %vm1673_vm7 = vcmask (!%p626_p12), 654336   ;;  %vm1690_vm8 = vcmask (!%p626_p12), 785408  }
  0x47   : > { %v672_v6 = vld [vmem:[%s4046_s13] sm:$0xff] (!%p626_p12)  ;;  %v673_v7 = vld [vmem:[%s4046_s13 + $0x8] sm:$0xff] (!%p626_p12)  ;;  %v674_v8 = vld [vmem:[%s4046_s13 + $0x10] sm:$0xff] (!%p626_p12)  ;;  %s4978_s15 = smov (!%p626_p12), 64   ;;  %s3780_s24 = smov (!%p626_p12), 80   ;;  %vm1707_vm9 = vcmask (!%p626_p12), 916480  }
  0x48   : > { %v736_v9 = vpack.c.bf16 (!%p626_p12), %v673_v7, %v672_v6  ;;  %v675_v10 = vld [vmem:[%s4046_s13 + $0x18] sm:$0xff] (!%p626_p12)  ;;  %v676_v11 = vld [vmem:[%s4046_s13 + $0x20] sm:$0xff] (!%p626_p12)  ;;  %v677_v12 = vld [vmem:[%s4046_s13 + $0x28] sm:$0xff] (!%p626_p12)  ;;  %s3781_s25 = smov (!%p626_p12), 48   ;;  %s3782_s29 = smov (!%p626_p12), 16   ;;  %vm3786_vm12 = vmmov (!%p626_p12), 0  }
  0x49   : > { %v737_v13 = vpack.c.bf16 (!%p626_p12), %v675_v10, %v674_v8  ;;  %v738_v14 = vpack.c.bf16 (!%p626_p12), %v677_v12, %v676_v11  ;;  %v678_v15 = vld [vmem:[%s4046_s13 + $0x30] sm:$0xff] (!%p626_p12)  ;;  %v679_v16 = vld [vmem:[%s4046_s13 + $0x38] sm:$0xff] (!%p626_p12)  ;;  %v680_v17 = vld [vmem:[%s4046_s13 + $0x40] sm:$0xff] (!%p626_p12)  ;;  %s4976_s14 = smov (!%p626_p12), 96   ;;  %s3784_s16 = smov (!%p626_p12), 112  }
  0x4a   : > { %v3639_v0 = vld [vmem:[%s4988_s1] sm:$0xff] (!%p626_p12)   ;;  %v3640_v1 = vld [vmem:[%s4988_s1 + $0x8] sm:$0x3f] (!%p626_p12)   ;;  %3205 = vmatprep.mubr.msk.bf16.mxu0 (!%p626_p12), %vm790_vm2, %v736_v9  ;;  %v739_v19 = vpack.c.bf16 (!%p626_p12), %v679_v16, %v678_v15  ;;  %v682_v21 = vld [vmem:[%s4046_s13 + $0x50] sm:$0xff] (!%p626_p12)  ;;  %s4980_s22 = smov (!%p626_p12), 32   ;;  %s4995_s21 = sadd.s32 (!%p626_p12), 4294967295, %s3774_s20  }
  0x4b   : > { %3201 = vmatprep.subr.bf16.mxu0 (!%p626_p12), %v3639_v0  ;;  %v892_v5 = vand.u32 (!%p626_p12), %v3640_v1, %v890_v4  ;;  %v681_v18 = vld [vmem:[%s4046_s13 + $0x48] sm:$0xff] (!%p626_p12)  ;;  %v683_v22 = vld [vmem:[%s4046_s13 + $0x58] sm:$0xff] (!%p626_p12)  ;;  %v684_v23 = vld [vmem:[%s4046_s13 + $0x60] sm:$0xff] (!%p626_p12)  ;;  %s2851_s1 = scalar_lea.sflag (!%p626_p12), [#allocation4], %s4043_s30 }
  0x4c   : > { %3202 = vmatpush3.bf16.msra.mxu0 %v3639_v0  ;;  %v740_v20 = vpack.c.bf16 %v681_v18, %v680_v17  ;;  %v685_v24 = vld [vmem:[%s4046_s13 + $0x68] sm:$0xff]  ;;  %v741_v25 = vpack.c.bf16 %v683_v22, %v682_v21  ;;  %v686_v27 = vld [vmem:[%s4046_s13 + $0x70] sm:$0xff]  ;;  %v687_v28 = vld [vmem:[%s4046_s13 + $0x78] sm:$0xff] }
  0x4d   : > { %3203 = vmatprep.subr.bf16.mxu0 %v892_v5  ;;  %v742_v26 = vpack.c.bf16 %v685_v24, %v684_v23  ;;  %v688_v29 = vld [vmem:[%s4046_s13 + $0x80] sm:$0xff]  ;;  %v689_v30 = vld [vmem:[%s4046_s13 + $0x88] sm:$0xff]  ;;  %v743_v31 = vpack.c.bf16 %v687_v28, %v686_v27  ;;  %v690_v33 = vld [vmem:[%s4046_s13 + $0x90] sm:$0xff] }
  0x4e   : > { %v744_v32 = vpack.c.bf16 %v689_v30, %v688_v29  ;;  %v691_v34 = vld [vmem:[%s4046_s13 + $0x98] sm:$0xff]  ;;  %v692_v35 = vld [vmem:[%s4046_s13 + $0xa0] sm:$0xff]  ;;  %v693_v36 = vld [vmem:[%s4046_s13 + $0xa8] sm:$0xff] }
  0x4f   : > { %v745_v37 = vpack.c.bf16 %v691_v34, %v690_v33  ;;  %v746_v38 = vpack.c.bf16 %v693_v36, %v692_v35  ;;  %v694_v39 = vld [vmem:[%s4046_s13 + $0xb0] sm:$0xff]  ;;  %v695_v40 = vld [vmem:[%s4046_s13 + $0xb8] sm:$0xff]  ;;  %v696_v41 = vld [vmem:[%s4046_s13 + $0xc0] sm:$0xff] }
  0x50   : > { %3204 = vmatpush3.bf16.msra.mxu0 %v892_v5  ;;  %v697_v42 = vld [vmem:[%s4046_s13 + $0xc8] sm:$0xff]  ;;  %v747_v43 = vpack.c.bf16 %v695_v40, %v694_v39  ;;  %v698_v45 = vld [vmem:[%s4046_s13 + $0xd0] sm:$0xff]  ;;  %v699_v46 = vld [vmem:[%s4046_s13 + $0xd8] sm:$0xff]  ;;  %v3777_v39 = vmov 0  }
  0x51   : > { %v748_v44 = vpack.c.bf16 %v697_v42, %v696_v41  ;;  %v700_v47 = vld [vmem:[%s4046_s13 + $0xe0] sm:$0xff]  ;;  %v701_v48 = vld [vmem:[%s4046_s13 + $0xe8] sm:$0xff]  ;;  %v749_v49 = vpack.c.bf16 %v699_v46, %v698_v45  ;;  %v702_v51 = vld [vmem:[%s4046_s13 + $0xf0] sm:$0xff]  ;;  %1843 = vmatprep.subr.bf16.mxu1 %v3777_v39 }
  0x52   : > { %v750_v50 = vpack.c.bf16 %v701_v48, %v700_v47  ;;  %v703_v52 = vld [vmem:[%s4046_s13 + $0xf8] sm:$0xff]  ;;  %v704_v53 = vld [vmem:[%s4046_s13 + $0x100] sm:$0xff]  ;;  %v705_v54 = vld [vmem:[%s4046_s13 + $0x108] sm:$0xff] }
  0x53   : > { %3206 = vmatmul.mubr.msk.bf16.vlgmr.msra.gmra.mrb[0].mxu0 %vm790_vm2, %v737_v13  ;;  %v751_v55 = vpack.c.bf16 %v703_v52, %v702_v51  ;;  %v752_v56 = vpack.c.bf16 %v705_v54, %v704_v53  ;;  %v706_v57 = vld [vmem:[%s4046_s13 + $0x110] sm:$0xff]  ;;  %v707_v58 = vld [vmem:[%s4046_s13 + $0x118] sm:$0xff]  ;;  %v708_v59 = vld [vmem:[%s4046_s13 + $0x120] sm:$0xff] }
  0x54   : > { %3209 = vmatprep.mubr.msk.bf16.mxu0 %vm790_vm2, %v738_v14  ;;  %v709_v60 = vld [vmem:[%s4046_s13 + $0x128] sm:$0xff]  ;;  %v753_v61 = vpack.c.bf16 %v707_v58, %v706_v57  ;;  %v710_v63 = vld [vmem:[%s4046_s13 + $0x130] sm:$0xff]  ;;  %v711_v0 = vld [vmem:[%s4046_s13 + $0x138] sm:$0xff] }
  0x55   : > { %v754_v62 = vpack.c.bf16 %v709_v60, %v708_v59  ;;  %v712_v1 = vld [vmem:[%s4046_s13 + $0x140] sm:$0xff]  ;;  %v713_v2 = vld [vmem:[%s4046_s13 + $0x148] sm:$0xff]  ;;  %v755_v3 = vpack.c.bf16 %v711_v0, %v710_v63  ;;  %v714_v5 = vld [vmem:[%s4046_s13 + $0x150] sm:$0xff] }
  0x56   : > { %v756_v4 = vpack.c.bf16 %v713_v2, %v712_v1  ;;  %v715_v6 = vld [vmem:[%s4046_s13 + $0x158] sm:$0xff]  ;;  %v716_v7 = vld [vmem:[%s4046_s13 + $0x160] sm:$0xff]  ;;  %v717_v8 = vld [vmem:[%s4046_s13 + $0x168] sm:$0xff] }
  0x57   : > { %v757_v9 = vpack.c.bf16 %v715_v6, %v714_v5  ;;  %v758_v10 = vpack.c.bf16 %v717_v8, %v716_v7  ;;  %v718_v11 = vld [vmem:[%s4046_s13 + $0x170] sm:$0xff]  ;;  %v719_v12 = vld [vmem:[%s4046_s13 + $0x178] sm:$0xff]  ;;  %v720_v13 = vld [vmem:[%s4046_s13 + $0x180] sm:$0xff] }
  0x58   : > { %v721_v14 = vld [vmem:[%s4046_s13 + $0x188] sm:$0xff]  ;;  %v759_v15 = vpack.c.bf16 %v719_v12, %v718_v11  ;;  %v722_v17 = vld [vmem:[%s4046_s13 + $0x190] sm:$0xff]  ;;  %v723_v18 = vld [vmem:[%s4046_s13 + $0x198] sm:$0xff] }
  0x59   : > { %v760_v16 = vpack.c.bf16 %v721_v14, %v720_v13  ;;  %v761_v21 = vpack.c.bf16 %v723_v18, %v722_v17  ;;  %v726_v23 = vld [vmem:[%s4046_s13 + $0x1b0] sm:$0xff]  ;;  %v727_v24 = vld [vmem:[%s4046_s13 + $0x1b8] sm:$0xff]  ;;  %v3642_v40 = vld [vmem:[%s4966_s3 + $0x8] sm:$0xff]  }
  0x5a   : > { %v763_v27 = vpack.c.bf16 %v727_v24, %v726_v23  ;;  %v730_v29 = vld [vmem:[%s4046_s13 + $0x1d0] sm:$0xff]  ;;  %v731_v30 = vld [vmem:[%s4046_s13 + $0x1d8] sm:$0xff]  ;;  %v4155_v41 = vld [vmem:[%s4989_s2] ss:$0 sm:$0xff] }
  0x5b   : > { %3210 = vmatmul.mubr.msk.bf16.gmra.mrb[4].mxu0 %vm790_vm2, %v739_v19  ;;  %v724_v19 = vld [vmem:[%s4046_s13 + $0x1a0] sm:$0xff]  ;;  %v765_v33 = vpack.c.bf16 %v731_v30, %v730_v29  ;;  %v734_v35 = vld [vmem:[%s4046_s13 + $0x1f0] sm:$0xff]  ;;  %v735_v36 = vld [vmem:[%s4046_s13 + $0x1f8] sm:$0xff] }
  0x5c   : > { %3213 = vmatprep.mubr.msk.bf16.mxu0 %vm790_vm2, %v740_v20  ;;  %v725_v20 = vld [vmem:[%s4046_s13 + $0x1a8] sm:$0xff]  ;;  %v3644_v53 = vld [vmem:[%s4966_s3 + $0x18] sm:$0xff]   ;;  %v3645_v59 = vld [vmem:[%s4966_s3 + $0x20] sm:$0xff]  }
  0x5d   : > { %v762_v22 = vpack.c.bf16 %v725_v20, %v724_v19  ;;  %v3646_v7 = vld [vmem:[%s4966_s3 + $0x28] sm:$0xff]   ;;  %v3647_v11 = vld [vmem:[%s4966_s3 + $0x30] sm:$0xff]   ;;  %v3648_v24 = vld [vmem:[%s4966_s3 + $0x38] sm:$0xff]  }
  0x5e   : > { %vm3048_vm10 = vmneg %vm1656_vm6 }
  0x5f   : > { %vm4745_vm11 = vmpackc.low %vm3048_vm10, %vm3048_vm10 }
  0x63   : > { %3214 = vmatmul.mubr.msk.bf16.gmra.mrb[8].mxu0 %vm790_vm2, %v741_v25  ;;  %v728_v25 = vld [vmem:[%s4046_s13 + $0x1c0] sm:$0xff] }
  0x64   : > { %3217 = vmatprep.mubr.msk.bf16.mxu0 %vm790_vm2, %v742_v26  ;;  %v729_v26 = vld [vmem:[%s4046_s13 + $0x1c8] sm:$0xff] }
  0x65   : > { %v764_v28 = vpack.c.bf16 %v729_v26, %v728_v25 }
  0x6b   : > { %3218 = vmatmul.mubr.msk.bf16.gmra.mrb[12].mxu0 %vm790_vm2, %v743_v31  ;;  %v732_v31 = vld [vmem:[%s4046_s13 + $0x1e0] sm:$0xff] }
  0x6c   : > { %3221 = vmatprep.mubr.msk.bf16.mxu0 %vm790_vm2, %v744_v32  ;;  %v733_v32 = vld [vmem:[%s4046_s13 + $0x1e8] sm:$0xff] }
  0x6d   : > { %v766_v34 = vpack.c.bf16 %v733_v32, %v732_v31  ;;  %v3649_v32 = vld [vmem:[%s4966_s3 + $0x40] sm:$0xff]  }
  0x73   : > { %3222 = vmatmul.mubr.msk.bf16.gmra.mrb[16].mxu0 %vm790_vm2, %v745_v37  ;;  %v767_v37 = vpack.c.bf16 %v735_v36, %v734_v35 }
  0x74   : > { %3225 = vmatprep.mubr.msk.bf16.mxu0 %vm790_vm2, %v746_v38  ;;  %v3641_v38 = vld [vmem:[%s4966_s3] sm:$0xff]  }
  0x75   : > { %1844 = vmatpush1.bf16.msra.mxu1 %v3641_v38 }
  0x76   : > { %1845 = vmatprep.subr.bf16.mxu1 %v3777_v39 }
  0x79   : > { %1846 = vmatpush1.bf16.msra.mxu1 %v3642_v40 }
  0x7a   : > { %1847 = vmatprep.subr.bf16.mxu1 %v3777_v39 }
  0x7b   : > { %3226 = vmatmul.mubr.msk.bf16.gmra.mrb[20].mxu0 %vm790_vm2, %v747_v43  ;;  %v3643_v43 = vld [vmem:[%s4966_s3 + $0x10] sm:$0xff]  }
  0x7c   : > { %3229 = vmatprep.mubr.msk.bf16.mxu0 %vm790_vm2, %v748_v44 }
  0x7d   : > { %1848 = vmatpush1.bf16.msra.mxu1 %v3643_v43 }
  0x7e   : > { %1849 = vmatprep.subr.bf16.mxu1 %v3777_v39 }
  0x81   : > { %1850 = vmatpush1.bf16.msra.mxu1 %v3644_v53 }
  0x82   : > { %1851 = vmatprep.subr.bf16.mxu1 %v3777_v39 }
  0x83   : > { %3230 = vmatmul.mubr.msk.bf16.gmra.mrb[24].mxu0 %vm790_vm2, %v749_v49 }
  0x84   : > { %3233 = vmatprep.mubr.msk.bf16.mxu0 %vm790_vm2, %v750_v50 }
  0x85   : > { %1852 = vmatpush1.bf16.msra.mxu1 %v3645_v59 }
  0x86   : > { %1853 = vmatprep.subr.bf16.mxu1 %v3777_v39 }
  0x89   : > { %1854 = vmatpush1.bf16.msra.mxu1 %v3646_v7 }
  0x8a   : > { %1855 = vmatprep.subr.bf16.mxu1 %v3777_v39 }
  0x8b   : > { %3234 = vmatmul.mubr.msk.bf16.gmra.mrb[28].mxu0 %vm790_vm2, %v751_v55 }
  0x8c   : > { %3237 = vmatprep.mubr.msk.bf16.mxu0 %vm790_vm2, %v752_v56 }
  0x8d   : > { %1856 = vmatpush1.bf16.msra.mxu1 %v3647_v11 }
  0x8e   : > { %1857 = vmatprep.subr.bf16.mxu1 %v3777_v39 }
  0x91   : > { %1858 = vmatpush1.bf16.msra.mxu1 %v3648_v24 }
  0x92   : > { %1859 = vmatprep.subr.bf16.mxu1 %v3777_v39 }
  0x93   : > { %3238 = vmatmul.mubr.msk.bf16.gmra.mrb[32].mxu0 %vm790_vm2, %v753_v61 }
  0x94   : > { %3241 = vmatprep.mubr.msk.bf16.mxu0 %vm790_vm2, %v754_v62  ;;  %v3779_v62 = vmov 0.0  }
  0x95   : > { %1860 = vmatpush1.bf16.msra.mxu1 %v3649_v32 }
  0x9b   : > { %3242 = vmatmul.mubr.msk.bf16.gmra.mrb[36].mxu0 %vm790_vm2, %v755_v3 }
  0x9c   : > { %3245 = vmatprep.mubr.msk.bf16.mxu0 %vm790_vm2, %v756_v4 }
  0xa3   : > { %3246 = vmatmul.mubr.msk.bf16.gmra.mrb[40].mxu0 %vm790_vm2, %v757_v9 }
  0xa4   : > { %3249 = vmatprep.mubr.msk.bf16.mxu0 %vm790_vm2, %v758_v10 }
  0xab   : > { %3250 = vmatmul.mubr.msk.bf16.gmra.mrb[44].mxu0 %vm790_vm2, %v759_v15 }
  0xac   : > { %3253 = vmatprep.mubr.msk.bf16.mxu0 %vm790_vm2, %v760_v16 }
  0xb3   : > { %3254 = vmatmul.mubr.msk.bf16.gmra.mrb[48].mxu0 %vm790_vm2, %v761_v21 }
  0xb4   : > { %3257 = vmatprep.mubr.msk.bf16.mxu0 %vm790_vm2, %v762_v22 }
  0xbb   : > { %3258 = vmatmul.mubr.msk.bf16.gmra.mrb[52].mxu0 %vm790_vm2, %v763_v27 }
  0xbc   : > { %3261 = vmatprep.mubr.msk.bf16.mxu0 %vm790_vm2, %v764_v28 }
  0xc3   : > { %3262 = vmatmul.mubr.msk.bf16.gmra.mrb[56].mxu0 %vm790_vm2, %v765_v33 }
  0xc4   : > { %3265 = vmatprep.mubr.msk.bf16.mxu0 %vm790_vm2, %v766_v34 }
  0xcb   : > { %3266 = vmatmul.mubr.msk.bf16.gmra.mrb[60].mxu0 %vm790_vm2, %v767_v37 }
 0x126   : > { %v3207_v42 = vpop.f32.mrb[0].mxu0 }
 0x127   : > { %v937_v44 = vadd.f32 %v3207_v42, %v4155_v41  ;;  %v928_v45 = vpop.f32.mrb[1].mxu0 }
 0x128   : > { %v929_v46 = vadd.f32 %v4155_v41, %v928_v45  ;;  %v3208_v47 = vpop.f32.mrb[2].mxu0 }
 0x129   : > { %v1185_v48 = vmax.f32 %v937_v44, 0.0  ;;  %v940_v49 = vadd.f32 %v3208_v47, %v4155_v41  ;;  %v931_v50 = vpop.f32.mrb[3].mxu0 }
 0x12a   : > { %v1183_v51 = vmax.f32 %v929_v46, 0.0  ;;  %v932_v52 = vadd.f32 %v4155_v41, %v931_v50 }
 0x12b   : > { %v1186_v54 = vmax.f32 %v940_v49, 0.0 }
 0x12c   : > { %v1184_v55 = vmax.f32 %v932_v52, 0.0  ;;  %v3359_v56 = vpack.i.bf16 %v1185_v48, %v1183_v51 }
 0x12e   : > { %v3211_v57 = vpop.f32.mrb[4].mxu0  ;;  %3360 = vrot.lane.b32.xlu1 %v3359_v56, %s4978_s15  ;;  %v3369_v58 = vpack.i.bf16 %v1186_v54, %v1184_v55  ;;  %v3364_v63 = vpack.i.bf16 %v1184_v55, %v3779_v62 }
 0x12f   : > { %v953_v60 = vadd.f32 %v3211_v57, %v4155_v41  ;;  %v944_v61 = vpop.f32.mrb[5].mxu0 }
 0x130   : > { %v945_v0 = vadd.f32 %v4155_v41, %v944_v61  ;;  %v3212_v1 = vpop.f32.mrb[6].mxu0  ;;  %3370 = vrot.lane.b32.xlu0 %v3369_v58, %s3780_s24 }
 0x131   : > { %v1189_v2 = vmax.f32 %v953_v60, 0.0  ;;  %v956_v3 = vadd.f32 %v3212_v1, %v4155_v41  ;;  %v947_v4 = vpop.f32.mrb[7].mxu0 }
 0x132   : > { %v1187_v5 = vmax.f32 %v945_v0, 0.0  ;;  %v948_v6 = vadd.f32 %v4155_v41, %v947_v4  ;;  %3365 = vrot.lane.b32.xlu1 %v3364_v63, %s3781_s25 }
 0x133   : > { %v1190_v8 = vmax.f32 %v956_v3, 0.0 }
 0x134   : > { %v3374_v9 = vpack.i.bf16 %v1189_v2, %v1187_v5  ;;  %v1188_v10 = vmax.f32 %v948_v6, 0.0 }
 0x136   : > { %v3384_v12 = vpack.i.bf16 %v1190_v8, %v1188_v10  ;;  %v3379_v13 = vpack.i.bf16 %v1188_v10, %v1186_v54  ;;  %v3215_v14 = vpop.f32.mrb[8].mxu0  ;;  %3375 = vrot.lane.b32.xlu0 %v3374_v9, %s4978_s15 }
 0x137   : > { %v969_v15 = vadd.f32 %v3215_v14, %v4155_v41  ;;  %v960_v16 = vpop.f32.mrb[9].mxu0 }
 0x138   : > { %v961_v17 = vadd.f32 %v4155_v41, %v960_v16  ;;  %v3216_v18 = vpop.f32.mrb[10].mxu0  ;;  %3380 = vrot.lane.b32.xlu1 %v3379_v13, %s3781_s25 }
 0x139   : > { %v1193_v19 = vmax.f32 %v969_v15, 0.0  ;;  %v972_v20 = vadd.f32 %v3216_v18, %v4155_v41  ;;  %v963_v21 = vpop.f32.mrb[11].mxu0 }
 0x13a   : > { %v1191_v22 = vmax.f32 %v961_v17, 0.0  ;;  %v964_v23 = vadd.f32 %v4155_v41, %v963_v21 }
 0x13b   : > { %v4199_v25 = vmax.f32 %v972_v20, 0.0 }
 0x13c   : > { %v3394_v26 = vpack.i.bf16 %v1193_v19, %v1191_v22  ;;  %v3389_v27 = vpack.i.bf16 %v1191_v22, %v3779_v62  ;;  %v4202_v28 = vmax.f32 %v964_v23, 0.0  ;;  %3385 = vrot.lane.b32.xlu1 %v3384_v12, %s3780_s24 }
 0x13e   : > { %v3219_v29 = vpop.f32.mrb[12].mxu0  ;;  %3390 = vrot.lane.b32.xlu0 %v3389_v27, %s3782_s29  ;;  %v1725_v30 = vpack.c.bf16 %v4199_v25, %v4202_v28  ;;  %v3404_v31 = vpack.i.bf16 %v4202_v28, %v3779_v62 }
 0x13f   : > { %v4215_v33 = vadd.f32 %v3219_v29, %v4155_v41  ;;  %v976_v34 = vpop.f32.mrb[13].mxu0 }
 0x140   : > { %v977_v35 = vadd.f32 %v4155_v41, %v976_v34  ;;  %v3220_v36 = vpop.f32.mrb[14].mxu0  ;;  %2982 = vmatprep.mubr.msk.bf16.mxu1 %vm1611_vm3, %v1725_v30  ;;  %3405 = vrot.lane.b32.xlu1 %v3404_v31, %s4976_s14 }
 0x141   : > { %v1197_v37 = vmax.f32 %v4215_v33, 0.0  ;;  %v979_v38 = vpop.f32.mrb[15].mxu0 }
 0x142   : > { %v1195_v39 = vmax.f32 %v977_v35, 0.0  ;;  %v980_v40 = vadd.f32 %v4155_v41, %v979_v38  ;;  %3395 = vrot.lane.b32.xlu0 %v3394_v26, %s3784_s16 }
 0x144   : > { %v3414_v42 = vpack.i.bf16 %v1195_v39, %v1193_v19  ;;  %v3409_v43 = vpack.i.bf16 %v1197_v37, %v1195_v39  ;;  %v4223_v44 = vmax.f32 %v980_v40, 0.0  ;;  %v4248_v19 = vadd.f32 %v3220_v36, %v4155_v41 }
 0x146   : > { %v3223_v45 = vpop.f32.mrb[16].mxu0  ;;  %3400 = vrot.lane.b32.xlu0 %v3404_v31, %s4980_s22  ;;  %3410 = vrot.lane.b32.xlu1 %v3409_v43, %s3784_s16  ;;  %v3424_v50 = vpack.i.bf16 %v4223_v44, %v4199_v25  ;;  %v1198_v27 = vmax.f32 %v4248_v19, 0.0 }
 0x147   : > { %v1001_v46 = vadd.f32 %v3223_v45, %v4155_v41  ;;  %v992_v47 = vpop.f32.mrb[17].mxu0 }
 0x148   : > { %v993_v48 = vadd.f32 %v4155_v41, %v992_v47  ;;  %v3224_v49 = vpop.f32.mrb[18].mxu0 }
 0x149   : > { %v1201_v51 = vmax.f32 %v1001_v46, 0.0  ;;  %v1004_v52 = vadd.f32 %v3224_v49, %v4155_v41  ;;  %v995_v53 = vpop.f32.mrb[19].mxu0 }
 0x14a   : > { %v1199_v54 = vmax.f32 %v993_v48, 0.0  ;;  %v996_v55 = vadd.f32 %v4155_v41, %v995_v53  ;;  %3415 = vrot.lane.b32.xlu0 %v3414_v42, %s3782_s29  ;;  %3425 = vrot.lane.b32.xlu1 %v3424_v50, %s4980_s22 }
 0x14b   : > { %v1202_v56 = vmax.f32 %v1004_v52, 0.0 }
 0x14c   : > { %v3429_v57 = vpack.i.bf16 %v1201_v51, %v1199_v54  ;;  %v1200_v58 = vmax.f32 %v996_v55, 0.0 }
 0x14e   : > { %v3439_v59 = vpack.i.bf16 %v1202_v56, %v1200_v58  ;;  %v3227_v60 = vpop.f32.mrb[20].mxu0  ;;  %3420 = vrot.lane.b32.xlu0 %v3424_v50, %s4976_s14  ;;  %3430 = vrot.lane.b32.xlu1 %v3429_v57, %s4978_s15 }
 0x14f   : > { %v1017_v61 = vadd.f32 %v3227_v60, %v4155_v41  ;;  %v1008_v63 = vpop.f32.mrb[21].mxu0 }
 0x150   : > { %v1009_v0 = vadd.f32 %v4155_v41, %v1008_v63  ;;  %v3228_v1 = vpop.f32.mrb[22].mxu0 }
 0x151   : > { %v1205_v2 = vmax.f32 %v1017_v61, 0.0  ;;  %v1020_v3 = vadd.f32 %v3228_v1, %v4155_v41  ;;  %v1011_v4 = vpop.f32.mrb[23].mxu0 }
 0x152   : > { %v1203_v5 = vmax.f32 %v1009_v0, 0.0  ;;  %v1012_v6 = vadd.f32 %v4155_v41, %v1011_v4  ;;  %3435 = vrot.lane.b32.xlu0 %v3439_v59, %s3781_s25 }
 0x153   : > { %v1206_v7 = vmax.f32 %v1020_v3, 0.0 }
 0x154   : > { %v3444_v8 = vpack.i.bf16 %v1205_v2, %v1203_v5  ;;  %v1204_v9 = vmax.f32 %v1012_v6, 0.0 }
 0x156   : > { %v3449_v10 = vpack.i.bf16 %v1206_v7, %v1204_v9  ;;  %v3231_v11 = vpop.f32.mrb[24].mxu0  ;;  %3440 = vrot.lane.b32.xlu0 %v3439_v59, %s3780_s24 }
 0x157   : > { %v1033_v12 = vadd.f32 %v3231_v11, %v4155_v41  ;;  %v1024_v13 = vpop.f32.mrb[25].mxu0 }
 0x158   : > { %v1025_v14 = vadd.f32 %v4155_v41, %v1024_v13  ;;  %v3232_v15 = vpop.f32.mrb[26].mxu0  ;;  %3450 = vrot.lane.b32.xlu1 %v3449_v10, %s3780_s24 }
 0x159   : > { %v1209_v16 = vmax.f32 %v1033_v12, 0.0  ;;  %v1036_v17 = vadd.f32 %v3232_v15, %v4155_v41  ;;  %v1027_v18 = vpop.f32.mrb[27].mxu0 }
 0x15a   : > { %v1207_v20 = vmax.f32 %v1025_v14, 0.0  ;;  %v1028_v21 = vadd.f32 %v4155_v41, %v1027_v18  ;;  %3445 = vrot.lane.b32.xlu0 %v3444_v8, %s4978_s15 }
 0x15b   : > { %v4252_v24 = vmax.f32 %v1036_v17, 0.0 }
 0x15c   : > { %v3459_v22 = vpack.i.bf16 %v1207_v20, %v1197_v37  ;;  %v3454_v23 = vpack.i.bf16 %v1209_v16, %v1207_v20  ;;  %v4254_v26 = vmax.f32 %v1028_v21, 0.0 }
 0x15e   : > { %v3235_v29 = vpop.f32.mrb[28].mxu0  ;;  %3455 = vrot.lane.b32.xlu0 %v3454_v23, %s3784_s16  ;;  %3460 = vrot.lane.b32.xlu1 %v3459_v22, %s3782_s29  ;;  %v3469_v34 = vpack.i.bf16 %v4254_v26, %v1198_v27  ;;  %v3464_v35 = vpack.i.bf16 %v4252_v24, %v4254_v26 }
 0x15f   : > { %v4260_v30 = vadd.f32 %v3235_v29, %v4155_v41  ;;  %v1040_v31 = vpop.f32.mrb[29].mxu0 }
 0x160   : > { %v1041_v32 = vadd.f32 %v4155_v41, %v1040_v31  ;;  %v4263_v33 = vpop.f32.mrb[30].mxu0 }
 0x161   : > { %v1213_v36 = vmax.f32 %v4260_v30, 0.0  ;;  %v1043_v37 = vpop.f32.mrb[31].mxu0  ;;  %v4302_v31 = vadd.f32 %v4263_v33, %v4155_v41 }
 0x162   : > { %v1211_v38 = vmax.f32 %v1041_v32, 0.0  ;;  %v1044_v39 = vadd.f32 %v4155_v41, %v1043_v37  ;;  %3470 = vrot.lane.b32.xlu0 %v3469_v34, %s4980_s22  ;;  %3465 = vrot.lane.b32.xlu1 %v3464_v35, %s4976_s14 }
 0x164   : > { %v3479_v40 = vpack.i.bf16 %v1211_v38, %v1209_v16  ;;  %v3474_v42 = vpack.i.bf16 %v1213_v36, %v1211_v38  ;;  %v4274_v43 = vmax.f32 %v1044_v39, 0.0 }
 0x166   : > { %v3239_v45 = vpop.f32.mrb[32].mxu0  ;;  %3480 = vrot.lane.b32.xlu0 %v3479_v40, %s3782_s29  ;;  %3475 = vrot.lane.b32.xlu1 %v3474_v42, %s3784_s16  ;;  %v3484_v50 = vpack.i.bf16 %v4274_v43, %v4252_v24  ;;  %v1214_v42 = vmax.f32 %v4302_v31, 0.0 }
 0x167   : > { %v1065_v46 = vadd.f32 %v3239_v45, %v4155_v41  ;;  %v1056_v47 = vpop.f32.mrb[33].mxu0 }
 0x168   : > { %v1057_v48 = vadd.f32 %v4155_v41, %v1056_v47  ;;  %v3240_v49 = vpop.f32.mrb[34].mxu0 }
 0x169   : > { %v1217_v51 = vmax.f32 %v1065_v46, 0.0  ;;  %v1068_v52 = vadd.f32 %v3240_v49, %v4155_v41  ;;  %v1059_v53 = vpop.f32.mrb[35].mxu0 }
 0x16a   : > { %v1215_v54 = vmax.f32 %v1057_v48, 0.0  ;;  %v1060_v55 = vadd.f32 %v4155_v41, %v1059_v53  ;;  %3485 = vrot.lane.b32.xlu1 %v3484_v50, %s4980_s22 }
 0x16b   : > { %v1218_v56 = vmax.f32 %v1068_v52, 0.0 }
 0x16c   : > { %v3489_v57 = vpack.i.bf16 %v1217_v51, %v1215_v54  ;;  %v1216_v58 = vmax.f32 %v1060_v55, 0.0 }
 0x16e   : > { %v3499_v59 = vpack.i.bf16 %v1218_v56, %v1216_v58  ;;  %v3494_v60 = vpack.i.bf16 %v1216_v58, %v1204_v9  ;;  %v3243_v61 = vpop.f32.mrb[36].mxu0  ;;  %3490 = vrot.lane.b32.xlu0 %v3489_v57, %s4978_s15 }
 0x16f   : > { %v1081_v63 = vadd.f32 %v3243_v61, %v4155_v41  ;;  %v1072_v0 = vpop.f32.mrb[37].mxu0 }
 0x170   : > { %v1073_v1 = vadd.f32 %v4155_v41, %v1072_v0  ;;  %v3244_v2 = vpop.f32.mrb[38].mxu0  ;;  %3495 = vrot.lane.b32.xlu1 %v3494_v60, %s3781_s25 }
 0x171   : > { %v1221_v3 = vmax.f32 %v1081_v63, 0.0  ;;  %v1084_v4 = vadd.f32 %v3244_v2, %v4155_v41  ;;  %v1075_v5 = vpop.f32.mrb[39].mxu0 }
 0x172   : > { %v1219_v6 = vmax.f32 %v1073_v1, 0.0  ;;  %v1076_v7 = vadd.f32 %v4155_v41, %v1075_v5 }
 0x173   : > { %v1222_v8 = vmax.f32 %v1084_v4, 0.0 }
 0x174   : > { %v3504_v9 = vpack.i.bf16 %v1221_v3, %v1219_v6  ;;  %v1220_v10 = vmax.f32 %v1076_v7, 0.0  ;;  %3500 = vrot.lane.b32.xlu1 %v3499_v59, %s3780_s24 }
 0x176   : > { %v3514_v11 = vpack.i.bf16 %v1222_v8, %v1220_v10  ;;  %v3509_v12 = vpack.i.bf16 %v1220_v10, %v1218_v56  ;;  %v3247_v13 = vpop.f32.mrb[40].mxu0  ;;  %3505 = vrot.lane.b32.xlu0 %v3504_v9, %s4978_s15 }
 0x177   : > { %v1097_v14 = vadd.f32 %v3247_v13, %v4155_v41  ;;  %v1088_v15 = vpop.f32.mrb[41].mxu0 }
 0x178   : > { %v1089_v16 = vadd.f32 %v4155_v41, %v1088_v15  ;;  %v3248_v17 = vpop.f32.mrb[42].mxu0  ;;  %3510 = vrot.lane.b32.xlu1 %v3509_v12, %s3781_s25 }
 0x179   : > { %v1225_v18 = vmax.f32 %v1097_v14, 0.0  ;;  %v1091_v20 = vpop.f32.mrb[43].mxu0  ;;  %v1100_v46 = vadd.f32 %v3248_v17, %v4155_v41 }
 0x17a   : > { %v1223_v21 = vmax.f32 %v1089_v16, 0.0  ;;  %v1092_v22 = vadd.f32 %v4155_v41, %v1091_v20 }
 0x17b   : > { %v4322_v54 = vmax.f32 %v1100_v46, 0.0 }
 0x17c   : > { %v3524_v23 = vpack.i.bf16 %v1223_v21, %v1213_v36  ;;  %v3519_v29 = vpack.i.bf16 %v1225_v18, %v1223_v21  ;;  %v4297_v30 = vmax.f32 %v1092_v22, 0.0  ;;  %3515 = vrot.lane.b32.xlu1 %v3514_v11, %s3780_s24 }
 0x17e   : > { %v3251_v32 = vpop.f32.mrb[44].mxu0  ;;  %3520 = vrot.lane.b32.xlu0 %v3519_v29, %s3784_s16  ;;  %v3529_v36 = vpack.i.bf16 %v4297_v30, %v4274_v43  ;;  %v3534_v49 = vpack.i.bf16 %v4297_v30, %v1214_v42 }
 0x17f   : > { %v1113_v34 = vadd.f32 %v3251_v32, %v4155_v41  ;;  %v1104_v35 = vpop.f32.mrb[45].mxu0 }
 0x180   : > { %v1105_v37 = vadd.f32 %v4155_v41, %v1104_v35  ;;  %v3252_v38 = vpop.f32.mrb[46].mxu0  ;;  %3525 = vrot.lane.b32.xlu1 %v3524_v23, %s3782_s29 }
 0x181   : > { %v1229_v39 = vmax.f32 %v1113_v34, 0.0  ;;  %v1107_v40 = vpop.f32.mrb[47].mxu0  ;;  %v4325_v55 = vadd.f32 %v3252_v38, %v4155_v41 }
 0x182   : > { %v1227_v33 = vmax.f32 %v1105_v37, 0.0  ;;  %v1108_v45 = vadd.f32 %v4155_v41, %v1107_v40  ;;  %3530 = vrot.lane.b32.xlu0 %v3529_v36, %s4976_s14 }
 0x183   : > { %v1230_v2 = vmax.f32 %v4325_v55, 0.0 }
 0x184   : > { %v3544_v47 = vpack.i.bf16 %v1227_v33, %v1225_v18  ;;  %v3539_v48 = vpack.i.bf16 %v1229_v39, %v1227_v33  ;;  %1284 = vrot.lane.b32.xlu1 %v1229_v39, %s3782_s29  ;;  %v4318_v50 = vmax.f32 %v1108_v45, 0.0 }
 0x186   : > { %v3255_v51 = vpop.f32.mrb[48].mxu0  ;;  %3535 = vrot.lane.b32.xlu0 %v3534_v49, %s4980_s22  ;;  %v3554_v0 = vpack.i.bf16 %v4318_v50, %v4322_v54 }
 0x187   : > { %v1129_v52 = vadd.f32 %v3255_v51, %v4155_v41  ;;  %v1120_v53 = vpop.f32.mrb[49].mxu0 }
 0x188   : > { %v1121_v56 = vadd.f32 %v4155_v41, %v1120_v53  ;;  %v3256_v57 = vpop.f32.mrb[50].mxu0  ;;  %3540 = vrot.lane.b32.xlu1 %v3539_v48, %s3784_s16 }
 0x189   : > { %v1233_v58 = vmax.f32 %v1129_v52, 0.0  ;;  %v1132_v59 = vadd.f32 %v3256_v57, %v4155_v41  ;;  %v1123_v60 = vpop.f32.mrb[51].mxu0 }
 0x18a   : > { %v1231_v61 = vmax.f32 %v1121_v56, 0.0  ;;  %v1124_v63 = vadd.f32 %v4155_v41, %v1123_v60  ;;  %3545 = vrot.lane.b32.xlu0 %v3544_v47, %s3782_s29 }
 0x18b   : > { %v1234_v1 = vmax.f32 %v1132_v59, 0.0 }
 0x18c   : > { %v3559_v3 = vpack.i.bf16 %v1233_v58, %v1231_v61  ;;  %v1232_v4 = vmax.f32 %v1124_v63, 0.0  ;;  %3555 = vrot.lane.b32.xlu1 %v3554_v0, %s4980_s22 }
 0x18e   : > { %v3569_v5 = vpack.i.bf16 %v1234_v1, %v1232_v4  ;;  %v3259_v6 = vpop.f32.mrb[52].mxu0  ;;  %1335 = vrot.lane.b32.xlu0 %v1230_v2, %s4980_s22 }
 0x18f   : > { %v1145_v7 = vadd.f32 %v3259_v6, %v4155_v41  ;;  %v1136_v8 = vpop.f32.mrb[53].mxu0 }
 0x190   : > { %v1137_v9 = vadd.f32 %v4155_v41, %v1136_v8  ;;  %v3260_v10 = vpop.f32.mrb[54].mxu0  ;;  %3560 = vrot.lane.b32.xlu1 %v3559_v3, %s4978_s15 }
 0x191   : > { %v1237_v11 = vmax.f32 %v1145_v7, 0.0  ;;  %v1148_v12 = vadd.f32 %v3260_v10, %v4155_v41  ;;  %v1139_v13 = vpop.f32.mrb[55].mxu0 }
 0x192   : > { %v1235_v14 = vmax.f32 %v1137_v9, 0.0  ;;  %v1140_v15 = vadd.f32 %v4155_v41, %v1139_v13  ;;  %3550 = vrot.lane.b32.xlu0 %v3554_v0, %s4976_s14 }
 0x193   : > { %v1238_v16 = vmax.f32 %v1148_v12, 0.0 }
 0x194   : > { %v3579_v17 = vpack.i.bf16 %v1237_v11, %v1235_v14  ;;  %v1236_v18 = vmax.f32 %v1140_v15, 0.0 }
 0x196   : > { %v3584_v20 = vpack.i.bf16 %v1238_v16, %v1236_v18  ;;  %v3263_v21 = vpop.f32.mrb[56].mxu0  ;;  %3565 = vrot.lane.b32.xlu0 %v3569_v5, %s3781_s25 }
 0x197   : > { %v1161_v22 = vadd.f32 %v3263_v21, %v4155_v41  ;;  %v1152_v23 = vpop.f32.mrb[57].mxu0 }
 0x198   : > { %v1153_v29 = vadd.f32 %v4155_v41, %v1152_v23  ;;  %v3264_v32 = vpop.f32.mrb[58].mxu0 }
 0x199   : > { %v1241_v34 = vmax.f32 %v1161_v22, 0.0  ;;  %v1164_v35 = vadd.f32 %v3264_v32, %v4155_v41  ;;  %v1155_v37 = vpop.f32.mrb[59].mxu0 }
 0x19a   : > { %v1239_v38 = vmax.f32 %v1153_v29, 0.0  ;;  %v1156_v36 = vadd.f32 %v4155_v41, %v1155_v37  ;;  %3570 = vrot.lane.b32.xlu0 %v3569_v5, %s3780_s24 }
 0x19b   : > { %v1242_v39 = vmax.f32 %v1164_v35, 0.0 }
 0x19c   : > { %v3574_v40 = vpack.i.bf16 %v1241_v34, %v1239_v38  ;;  %v1240_v33 = vmax.f32 %v1156_v36, 0.0 }
 0x19e   : > { %v4351_v45 = vpack.c.bf16 %v1242_v39, %v1240_v33  ;;  %v3267_v46 = vpop.f32.mrb[60].mxu0  ;;  %3575 = vrot.lane.b32.xlu0 %v3574_v40, %s3784_s16  ;;  %1540 = vrot.lane.b32.xlu1 %v1240_v33, %s4976_s14 }
 0x19f   : > { %v1177_v47 = vadd.f32 %v3267_v46, %v4155_v41  ;;  %v1168_v48 = vpop.f32.mrb[61].mxu0 }
 0x1a0   : > { %v1169_v49 = vadd.f32 %v4155_v41, %v1168_v48  ;;  %v3268_v51 = vpop.f32.mrb[62].mxu0  ;;  %v3361_v58 = vpop.permute.xlu1 %3360 }
 0x1a1   : > { %v1245_v52 = vmax.f32 %v1177_v47, 0.0  ;;  %v1180_v53 = vadd.f32 %v3268_v51, %v4155_v41  ;;  %v1171_v56 = vpop.f32.mrb[63].mxu0  ;;  %v3363_v29 = vunpack.i.h.bf16 %v3361_v58 }
 0x1a2   : > { %v1243_v57 = vmax.f32 %v1169_v49, 0.0  ;;  %v1172_v59 = vadd.f32 %v4155_v41, %v1171_v56  ;;  %3580 = vrot.lane.b32.xlu0 %v3579_v17, %s4978_s15  ;;  %1386 = vrot.lane.b32.xlu1 %v1236_v18, %s3781_s25  ;;  %v3371_v3 = vpop.permute.xlu0 %3370  ;;  %v3362_v17 = vunpack.i.l.bf16 %v3361_v58  ;;  %s4991_s25 = smov 64   ;;  %s4992_s15 = smov 96  }
 0x1a3   : > { %v1246_v60 = vmax.f32 %v1180_v53, 0.0  ;;  %v3372_v32 = vunpack.i.l.bf16 %v3371_v3  ;;  %v3373_v37 = vunpack.i.h.bf16 %v3371_v3 }
 0x1a4   : > { %v3594_v61 = vpack.i.bf16 %v1245_v52, %v1243_v57  ;;  %v1244_v63 = vmax.f32 %v1172_v59, 0.0  ;;  %v3366_v4 = vpop.permute.xlu1 %3365 }
 0x1a5   : > { %v4372_v13 = vunpack.i.l.bf16 %v3366_v4  ;;  %v3368_v15 = vunpack.i.h.bf16 %v3366_v4 }
 0x1a6   : > { %v3589_v0 = vpack.i.bf16 %v1244_v63, %v1242_v39  ;;  %v4361_v1 = vpack.c.bf16 %v1246_v60, %v1244_v63  ;;  %3585 = vrot.lane.b32.xlu1 %v3584_v20, %s3780_s24  ;;  %s4990_s24 = smov 32  }
 0x1a8   : > { %3590 = vrot.lane.b32.xlu0 %v3589_v0, %s4976_s14  ;;  %v3376_v5 = vpop.permute.xlu0 %3375  ;;  %s3074_s14 = sshll.u32 %s4995_s21, 7 }
 0x1a9   : > { %v3377_v38 = vunpack.i.l.bf16 %v3376_v5  ;;  %v3378_v48 = vunpack.i.h.bf16 %v3376_v5 }
 0x1aa   : > { %3595 = vrot.lane.b32.xlu1 %v3594_v61, %s3784_s16  ;;  %v3381_v41 = vpop.permute.xlu1 %3380  ;;  %s4919_s16 = scalar_lea.hbm %s4974_s11, %s3074_s14 }
 0x1ab   : > { %v3382_v22 = vunpack.i.l.bf16 %v3381_v41  ;;  %v3383_v34 = vunpack.i.h.bf16 %v3381_v41 }
 0x1ae   : > { %v3386_v7 = vpop.permute.xlu1 %3385 }
 0x1af   : > { %v3388_v0 = vunpack.i.h.bf16 %v3386_v7  ;;  %v3387_v3 = vunpack.i.l.bf16 %v3386_v7 }
 0x1b0   : > { %v4366_v6 = vpop.permute.xlu0 %3390 }
 0x1b1   : > { %v3392_v9 = vunpack.i.l.bf16 %v4366_v6  ;;  %v3393_v19 = vunpack.i.h.bf16 %v4366_v6 }
 0x1b2   : > { %v3406_v10 = vpop.permute.xlu1 %3405 }
 0x1b3   : > { %v1612_v14 = vsel %vm1611_vm3, 0.0, %v3392_v9  ;;  %v4385_v39 = vunpack.i.l.bf16 %v3406_v10  ;;  %v3408_v49 = vunpack.i.h.bf16 %v3406_v10 }
 0x1b4   : > { %v3396_v8 = vpop.permute.xlu0 %3395 }
 0x1b5   : > { %v3398_v51 = vunpack.i.h.bf16 %v3396_v8  ;;  %v3397_v52 = vunpack.i.l.bf16 %v3396_v8 }
 0x1b8   : > { %v4369_v11 = vpop.permute.xlu0 %3400  ;;  %v3411_v20 = vpop.permute.xlu1 %3410 }
 0x1b9   : > { %v3402_v12 = vunpack.i.l.bf16 %v4369_v11  ;;  %v3413_v7 = vunpack.i.h.bf16 %v3411_v20 }
 0x1bb   : > { %v1626_v16 = vsel %vm1625_vm4, %v1612_v14, %v3402_v12  ;;  %v1727_v14 = vpack.c.bf16 %v1198_v27, %v4223_v44  ;;  %v3403_v27 = vunpack.i.h.bf16 %v4369_v11 }
 0x1bc   : > { %v1640_v18 = vsel %vm1639_vm5, %v1626_v16, %v4372_v13  ;;  %v4380_v21 = vpop.permute.xlu0 %3415  ;;  %v1641_v23 = vsel %vm1639_vm5, %v1626_v16, %v3368_v15  ;;  %v1642_v36 = vsel %vm1639_vm5, %v1626_v16, %v3382_v22  ;;  %v1643_v40 = vsel %vm1639_vm5, %v1626_v16, %v3383_v34  ;;  %v4390_v53 = vpop.permute.xlu1 %3425 }
 0x1bd   : > { %v1657_v35 = vsel %vm1656_vm6, %v1640_v18, %v3362_v17  ;;  %v1658_v46 = vsel %vm1656_vm6, %v1641_v23, %v3363_v29  ;;  %v1659_v56 = vsel %vm1656_vm6, %v1642_v36, %v3377_v38  ;;  %v1660_v61 = vsel %vm1656_vm6, %v1643_v40, %v3378_v48 }
 0x1be   : > { %v1674_v47 = vsel %vm1673_vm7, %v1657_v35, %v3372_v32  ;;  %v1675_v57 = vsel %vm1673_vm7, %v1658_v46, %v3373_v37  ;;  %v1676_v9 = vsel %vm1673_vm7, %v1659_v56, %v3387_v3  ;;  %v1677_v10 = vsel %vm1673_vm7, %v1660_v61, %v3388_v0 }
 0x1bf   : > { %v1691_v58 = vsel %vm1690_vm8, %v1674_v47, %v4385_v39  ;;  %v1692_v63 = vsel %vm1690_vm8, %v1675_v57, %v3408_v49  ;;  %v3412_v17 = vunpack.i.l.bf16 %v3411_v20  ;;  %v3417_v23 = vunpack.i.l.bf16 %v4380_v21 }
 0x1c0   : > { %v3421_v33 = vpop.permute.xlu0 %3420  ;;  %v1708_v4 = vsel %vm1707_vm9, %v1691_v58, %v3397_v52  ;;  %v1709_v5 = vsel %vm1707_vm9, %v1692_v63, %v3398_v51  ;;  %v3431_v18 = vpop.permute.xlu1 %3430  ;;  %v3427_v20 = vunpack.i.l.bf16 %v4390_v53  ;;  %v1729_v40 = vpack.c.bf16 %v4252_v24, %v4254_v26 }
 0x1c1   : > { %v3423_v59 = vunpack.i.h.bf16 %v3421_v33  ;;  %v3422_v60 = vunpack.i.l.bf16 %v3421_v33  ;;  %v1724_v8 = vpack.c.bf16 %v1709_v5, %v1708_v4  ;;  %v1614_v38 = vsel %vm1611_vm3, %v4202_v28, %v3417_v23 }
 0x1c2   : > { %v1613_v33 = vsel %vm1611_vm3, 0.0, %v3393_v19  ;;  %v3432_v46 = vunpack.i.l.bf16 %v3431_v18  ;;  %v1628_v48 = vsel %vm1625_vm4, %v1614_v38, %v3427_v20  ;;  %v3433_v56 = vunpack.i.h.bf16 %v3431_v18 }
 0x1c3   : > { %v1693_v15 = vsel %vm1690_vm8, %v1676_v9, %v3422_v60  ;;  %v1694_v16 = vsel %vm1690_vm8, %v1677_v10, %v3423_v59  ;;  %1876 = vmatmul.mubr.bf16.vlgmr.msra.gmra.mrb[0].mxu1 %v1724_v8  ;;  %v1627_v6 = vsel %vm1625_vm4, %v1613_v33, %v3403_v27  ;;  %v3428_v31 = vunpack.i.h.bf16 %v4390_v53 }
 0x1c4   : > { %v4400_v41 = vpop.permute.xlu0 %3435  ;;  %2983 = vmatprep.mubr.msk.bf16.mxu1 %vm1611_vm3, %v1727_v14  ;;  %v1710_v29 = vsel %vm1707_vm9, %v1693_v15, %v3412_v17  ;;  %v1711_v32 = vsel %vm1707_vm9, %v1694_v16, %v3413_v7  ;;  %v1644_v57 = vsel %vm1639_vm5, %v1627_v6, %v4372_v13  ;;  %v1731_v16 = vpack.c.bf16 %v1214_v42, %v4274_v43 }
 0x1c5   : > { %v1726_v37 = vpack.c.bf16 %v1711_v32, %v1710_v29  ;;  %v3437_v36 = vunpack.i.l.bf16 %v4400_v41  ;;  %v1661_v58 = vsel %vm1656_vm6, %v1644_v57, %v3432_v46  ;;  %v3418_v29 = vunpack.i.h.bf16 %v4380_v21 }
 0x1c7   : > { %v1645_v51 = vsel %vm1639_vm5, %v1628_v48, %v3437_v36  ;;  %v1615_v20 = vsel %vm1611_vm3, %v4199_v25, %v3418_v29 }
 0x1c8   : > { %v3441_v22 = vpop.permute.xlu0 %3440  ;;  %v1662_v60 = vsel %vm1656_vm6, %v1645_v51, %v3433_v56  ;;  %v1629_v6 = vsel %vm1625_vm4, %v1615_v20, %v3428_v31 }
 0x1c9   : > { %v3442_v49 = vunpack.i.l.bf16 %v3441_v22  ;;  %v3443_v28 = vunpack.i.h.bf16 %v3441_v22 }
 0x1ca   : > { %v4415_v34 = vpop.permute.xlu1 %3450 }
 0x1cb   : > { %1884 = vmatmul.mubr.bf16.gmra.mrb[4].mxu1 %v1726_v37  ;;  %v1678_v61 = vsel %vm1673_vm7, %v1661_v58, %v3442_v49  ;;  %v1679_v3 = vsel %vm1673_vm7, %v1662_v60, %v3443_v28  ;;  %v3438_v37 = vunpack.i.h.bf16 %v4400_v41  ;;  %v3453_v60 = vunpack.i.h.bf16 %v4415_v34 }
 0x1cc   : > { %v4417_v35 = vpop.permute.xlu0 %3445  ;;  %2984 = vmatprep.mubr.msk.bf16.mxu1 %vm1611_vm3, %v1729_v40  ;;  %v1695_v9 = vsel %vm1690_vm8, %v1678_v61, %v4385_v39 }
 0x1cd   : > { %v3447_v40 = vunpack.i.l.bf16 %v4417_v35  ;;  %v1646_v48 = vsel %vm1639_vm5, %v1629_v6, %v3438_v37  ;;  %v3448_v28 = vunpack.i.h.bf16 %v4417_v35 }
 0x1d0   : > { %v3461_v47 = vpop.permute.xlu1 %3460  ;;  %v3456_v52 = vpop.permute.xlu0 %3455 }
 0x1d1   : > { %v3457_v63 = vunpack.i.l.bf16 %v3456_v52  ;;  %v3458_v4 = vunpack.i.h.bf16 %v3456_v52  ;;  %v3462_v19 = vunpack.i.l.bf16 %v3461_v47  ;;  %v3463_v46 = vunpack.i.h.bf16 %v3461_v47 }
 0x1d2   : > { %v3452_v47 = vunpack.i.l.bf16 %v4415_v34 }
 0x1d3   : > { %v1712_v14 = vsel %vm1707_vm9, %v1695_v9, %v3457_v63  ;;  %v1616_v21 = vsel %vm1611_vm3, %v4223_v44, %v3462_v19  ;;  %v1663_v44 = vsel %vm1656_vm6, %v1646_v48, %v3447_v40  ;;  %v1617_v61 = vsel %vm1611_vm3, 0.0, %v3463_v46 }
 0x1d4   : > { %v3466_v59 = vpop.permute.xlu1 %3465  ;;  %v3471_v7 = vpop.permute.xlu0 %3470  ;;  %v1680_v35 = vsel %vm1673_vm7, %v1663_v44, %v3452_v47 }
 0x1d5   : > { %v3467_v0 = vunpack.i.l.bf16 %v3466_v59  ;;  %v3472_v42 = vunpack.i.l.bf16 %v3471_v7  ;;  %v3473_v25 = vunpack.i.h.bf16 %v3471_v7  ;;  %v3468_v52 = vunpack.i.h.bf16 %v3466_v59 }
 0x1d7   : > { %v1696_v5 = vsel %vm1690_vm8, %v1679_v3, %v3467_v0  ;;  %v1630_v53 = vsel %vm1625_vm4, %v1616_v21, %v3472_v42  ;;  %v1631_v0 = vsel %vm1625_vm4, %v1617_v61, %v3473_v25 }
 0x1d8   : > { %v4437_v8 = vpop.permute.xlu1 %3475  ;;  %v1713_v10 = vsel %vm1707_vm9, %v1696_v5, %v3458_v4  ;;  %v4449_v22 = vpop.permute.xlu0 %3480  ;;  %v1697_v5 = vsel %vm1690_vm8, %v1680_v35, %v3468_v52 }
 0x1d9   : > { %v1728_v15 = vpack.c.bf16 %v1713_v10, %v1712_v14  ;;  %v3482_v41 = vunpack.i.l.bf16 %v4449_v22  ;;  %v3477_v3 = vunpack.i.l.bf16 %v4437_v8  ;;  %v3478_v9 = vunpack.i.h.bf16 %v4437_v8 }
 0x1db   : > { %1892 = vmatmul.mubr.bf16.gmra.mrb[8].mxu1 %v1728_v15  ;;  %v1618_v59 = vsel %vm1611_vm3, %v4254_v26, %v3482_v41  ;;  %v1714_v20 = vsel %vm1707_vm9, %v1697_v5, %v3477_v3  ;;  %v1735_v5 = vpack.c.bf16 %v1230_v2, %v4318_v50 }
 0x1dc   : > { %2985 = vmatprep.mubr.msk.bf16.mxu1 %vm1611_vm3, %v1731_v16  ;;  %v4447_v17 = vpop.permute.xlu1 %3485 }
 0x1dd   : > { %v3487_v56 = vunpack.i.l.bf16 %v4447_v17  ;;  %v3488_v48 = vunpack.i.h.bf16 %v4447_v17 }
 0x1df   : > { %v1632_v34 = vsel %vm1625_vm4, %v1618_v59, %v3487_v56 }
 0x1e0   : > { %v3491_v32 = vpop.permute.xlu0 %3490 }
 0x1e1   : > { %v3492_v14 = vunpack.i.l.bf16 %v3491_v32  ;;  %v3493_v26 = vunpack.i.h.bf16 %v3491_v32 }
 0x1e2   : > { %v3496_v18 = vpop.permute.xlu1 %3495 }
 0x1e3   : > { %v3497_v38 = vunpack.i.l.bf16 %v3496_v18  ;;  %v3498_v57 = vunpack.i.h.bf16 %v3496_v18 }
 0x1e5   : > { %v1647_v49 = vsel %vm1639_vm5, %v1630_v53, %v3497_v38  ;;  %v1649_v15 = vsel %vm1639_vm5, %v1632_v34, %v3498_v57  ;;  %v1648_v38 = vsel %vm1639_vm5, %v1631_v0, %v4372_v13  ;;  %v1733_v53 = vpack.c.bf16 %v4322_v54, %v4297_v30 }
 0x1e6   : > { %v4451_v23 = vpop.permute.xlu1 %3500  ;;  %v1664_v63 = vsel %vm1656_vm6, %v1647_v49, %v3448_v28  ;;  %v1666_v40 = vsel %vm1656_vm6, %v1649_v15, %v3493_v26  ;;  %v1665_v6 = vsel %vm1656_vm6, %v1648_v38, %v3492_v14 }
 0x1e7   : > { %v3503_v16 = vunpack.i.h.bf16 %v4451_v23  ;;  %v1681_v7 = vsel %vm1673_vm7, %v1664_v63, %v3453_v60  ;;  %v3502_v29 = vunpack.i.l.bf16 %v4451_v23  ;;  %v3483_v23 = vunpack.i.h.bf16 %v4449_v22 }
 0x1e8   : > { %v4460_v36 = vpop.permute.xlu0 %3505 }
 0x1e9   : > { %v1683_v46 = vsel %vm1673_vm7, %v1666_v40, %v3503_v16  ;;  %v1682_v25 = vsel %vm1673_vm7, %v1665_v6, %v3502_v29  ;;  %v1619_v47 = vsel %vm1611_vm3, %v4252_v24, %v3483_v23  ;;  %v3508_v24 = vunpack.i.h.bf16 %v4460_v36 }
 0x1ea   : > { %v4454_v27 = vpop.permute.xlu1 %3510  ;;  %v1633_v61 = vsel %vm1625_vm4, %v1619_v47, %v3488_v48 }
 0x1eb   : > { %v3512_v28 = vunpack.i.l.bf16 %v4454_v27  ;;  %v3513_v57 = vunpack.i.h.bf16 %v4454_v27  ;;  %v3507_v27 = vunpack.i.l.bf16 %v4460_v36 }
 0x1ee   : > { %v4465_v33 = vpop.permute.xlu1 %3515 }
 0x1ef   : > { %v3517_v63 = vunpack.i.l.bf16 %v4465_v33  ;;  %v3518_v14 = vunpack.i.h.bf16 %v4465_v33 }
 0x1f0   : > { %v4472_v51 = vpop.permute.xlu0 %3520 }
 0x1f1   : > { %v3523_v44 = vunpack.i.h.bf16 %v4472_v51  ;;  %v3522_v22 = vunpack.i.l.bf16 %v4472_v51  ;;  %v1699_v51 = vsel %vm1690_vm8, %v1682_v25, %v4385_v39 }
 0x1f2   : > { %v4478_v58 = vpop.permute.xlu1 %3525 }
 0x1f3   : > { %v3527_v8 = vunpack.i.l.bf16 %v4478_v58  ;;  %v1716_v59 = vsel %vm1707_vm9, %v1699_v51, %v3522_v22  ;;  %v3528_v36 = vunpack.i.h.bf16 %v4478_v58 }
 0x1f4   : > { %v3531_v4 = vpop.permute.xlu0 %3530 }
 0x1f5   : > { %v3532_v10 = vunpack.i.l.bf16 %v3531_v4  ;;  %v3533_v19 = vunpack.i.h.bf16 %v3531_v4  ;;  %v1620_v52 = vsel %vm1611_vm3, %v4274_v43, %v3527_v8  ;;  %v1650_v43 = vsel %vm1639_vm5, %v1633_v61, %v3512_v28 }
 0x1f6   : > { %v4494_v18 = vpop.permute.xlu1 %1284  ;;  %v1621_v40 = vsel %vm1611_vm3, 0.0, %v3528_v36 }
 0x1f7   : > { %v1698_v31 = vsel %vm1690_vm8, %v1681_v7, %v3532_v10  ;;  %v1700_v41 = vsel %vm1690_vm8, %v1683_v46, %v3533_v19 }
 0x1f8   : > { %v4499_v42 = vpop.permute.xlu0 %3535  ;;  %v1715_v37 = vsel %vm1707_vm9, %v1698_v31, %v3478_v9  ;;  %v1717_v60 = vsel %vm1707_vm9, %v1700_v41, %v3523_v44  ;;  %v1667_v9 = vsel %vm1656_vm6, %v1650_v43, %v3507_v27 }
 0x1f9   : > { %v3537_v32 = vunpack.i.l.bf16 %v4499_v42  ;;  %v1730_v21 = vpack.c.bf16 %v1715_v37, %v1714_v20  ;;  %v1732_v4 = vpack.c.bf16 %v1717_v60, %v1716_v59  ;;  %v1684_v15 = vsel %vm1673_vm7, %v1667_v9, %v3517_v63 }
 0x1fa   : > { %v3541_v49 = vpop.permute.xlu1 %3540  ;;  %v3538_v7 = vunpack.i.h.bf16 %v4499_v42 }
 0x1fb   : > { %1900 = vmatmul.mubr.bf16.gmra.mrb[12].mxu1 %v1730_v21  ;;  %v1634_v17 = vsel %vm1625_vm4, %v1620_v52, %v3537_v32  ;;  %v3543_v26 = vunpack.i.h.bf16 %v3541_v49  ;;  %v3542_v29 = vunpack.i.l.bf16 %v3541_v49 }
 0x1fc   : > { %v4520_v56 = vpop.permute.xlu0 %3545  ;;  %2986 = vmatprep.mubr.msk.bf16.mxu1 %vm1611_vm3, %v1733_v53  ;;  %v1651_v0 = vsel %vm1639_vm5, %v1634_v17, %v3513_v57  ;;  %v1635_v23 = vsel %vm1625_vm4, %v1621_v40, %v3538_v7  ;;  %v3654_v40 = vld [vmem:[%s4970_s7 + $0x50] sm:$0xff]  }
 0x1fd   : > { %v3547_v34 = vunpack.i.l.bf16 %v4520_v56  ;;  %v1668_v10 = vsel %vm1656_vm6, %v1651_v0, %v3508_v24  ;;  %v1652_v25 = vsel %vm1639_vm5, %v1635_v23, %v4372_v13  ;;  %v3548_v57 = vunpack.i.h.bf16 %v4520_v56 }
 0x1fe   : > { %v4539_v3 = vpop.permute.xlu1 %3555  ;;  %v1685_v31 = vsel %vm1673_vm7, %v1668_v10, %v3518_v14  ;;  %v1624_v56 = vsel %vm1611_vm3, %v4318_v50, %v4494_v18 }
 0x1ff   : > { %v3557_v19 = vunpack.i.l.bf16 %v4539_v3  ;;  %v1622_v33 = vsel %vm1611_vm3, %v4297_v30, %v3547_v34  ;;  %v3558_v63 = vunpack.i.h.bf16 %v4539_v3  ;;  %v1623_v27 = vsel %vm1611_vm3, %v4322_v54, %v3548_v57 }
 0x200   : > { %v4534_v35 = vpop.permute.xlu0 %1335 }
 0x201   : > { %v1636_v6 = vsel %vm1625_vm4, %v1622_v33, %v3557_v19  ;;  %v1637_v3 = vsel %vm1625_vm4, %v1623_v27, %v3558_v63  ;;  %v3665_v63 = vld [vmem:[%s4968_s5 + $0x40] sm:$0xff]   ;;  %v3668_v27 = vld [vmem:[%s4968_s5 + $0x48] sm:$0xff]  }
 0x202   : > { %v3561_v8 = vpop.permute.xlu1 %3560  ;;  %3111 = vmatprep.subr.bf16.mxu1 %v3665_v63 }
 0x203   : > { %1908 = vmatmul.mubr.bf16.gmra.mrb[16].mxu1 %v1732_v4  ;;  %v3562_v46 = vunpack.i.l.bf16 %v3561_v8  ;;  %v3563_v53 = vunpack.i.h.bf16 %v3561_v8 }
 0x204   : > { %v3551_v16 = vpop.permute.xlu0 %3550  ;;  %2987 = vmatprep.mubr.msk.bf16.mxu1 %vm1611_vm3, %v1735_v5  ;;  %v1638_v5 = vsel %vm1625_vm4, %v1624_v56, %v4534_v35 }
 0x205   : > { %v3553_v55 = vunpack.i.h.bf16 %v3551_v16  ;;  %v3552_v2 = vunpack.i.l.bf16 %v3551_v16  ;;  %v1669_v28 = vsel %vm1656_vm6, %v1652_v25, %v3562_v46  ;;  %v3659_v25 = vld [vmem:[%s4970_s7 + $0x20] sm:$0xff]  }
 0x207   : > { %v1701_v20 = vsel %vm1690_vm8, %v1684_v15, %v3552_v2  ;;  %v1702_v37 = vsel %vm1690_vm8, %v1685_v31, %v3553_v55 }
 0x208   : > { %v3566_v38 = vpop.permute.xlu0 %3565  ;;  %v1718_v58 = vsel %vm1707_vm9, %v1701_v20, %v3542_v29  ;;  %v1719_v42 = vsel %vm1707_vm9, %v1702_v37, %v3543_v26  ;;  %v3650_v37 = vld [vmem:[%s4970_s7 + $0x40] sm:$0xff]  }
 0x209   : > { %v3567_v32 = vunpack.i.l.bf16 %v3566_v38  ;;  %v1734_v21 = vpack.c.bf16 %v1719_v42, %v1718_v58  ;;  %v3568_v4 = vunpack.i.h.bf16 %v3566_v38  ;;  %v3651_v38 = vld [vmem:[%s4970_s7] sm:$0xff]   ;;  %v3652_v58 = vld [vmem:[%s4970_s7 + $0x48] sm:$0xff]   ;;  %3143 = vmatprep.subr.bf16.mxu0 %v3650_v37 }
 0x20a   : > { %3144 = vmatpush3.bf16.msra.mxu0 %v3651_v38  ;;  %v3653_v42 = vld [vmem:[%s4970_s7 + $0x8] sm:$0xff]  }
 0x20b   : > { %v1653_v30 = vsel %vm1639_vm5, %v1636_v6, %v3567_v32  ;;  %1916 = vmatmul.mubr.bf16.gmra.mrb[20].mxu1 %v1734_v21  ;;  %v1654_v50 = vsel %vm1639_vm5, %v1637_v3, %v3568_v4  ;;  %3145 = vmatprep.subr.bf16.mxu0 %v3652_v58  ;;  %v3655_v32 = vld [vmem:[%s4970_s7 + $0x10] sm:$0xff]   ;;  %v3669_v4 = vld [vmem:[%s4968_s5 + $0x8] sm:$0xff]  }
 0x20c   : > { %v3571_v48 = vpop.permute.xlu0 %3570  ;;  %2988 = vmatprep.mubr.msk.bf16.mxu1 %vm1611_vm3, %v4351_v45  ;;  %v1670_v44 = vsel %vm1656_vm6, %v1653_v30, %v3563_v53  ;;  %v3656_v30 = vld [vmem:[%s4970_s7 + $0x58] sm:$0xff]  }
 0x20d   : > { %v3573_v41 = vunpack.i.h.bf16 %v3571_v48  ;;  %v3572_v49 = vunpack.i.l.bf16 %v3571_v48  ;;  %v3657_v53 = vld [vmem:[%s4970_s7 + $0x18] sm:$0xff]   ;;  %v3658_v48 = vld [vmem:[%s4970_s7 + $0x60] sm:$0xff]  }
 0x20e   : > { %3146 = vmatpush3.bf16.msra.mxu0 %v3653_v42 }
 0x20f   : > { %v1686_v22 = vsel %vm1673_vm7, %v1669_v28, %v3572_v49  ;;  %v1687_v52 = vsel %vm1673_vm7, %v1670_v44, %v3573_v41  ;;  %3147 = vmatprep.subr.bf16.mxu0 %v3654_v40  ;;  %v3660_v41 = vld [vmem:[%s4970_s7 + $0x68] sm:$0xff]   ;;  %v4637_v49 = vld [vmem:[%s4967_s4] ss:$0 sm:$0xff] }
 0x210   : > { %v3576_v17 = vpop.permute.xlu0 %3575  ;;  %v1541_v47 = vpop.permute.xlu1 %1540  ;;  %v1703_v13 = vsel %vm1690_vm8, %v1686_v22, %v4385_v39 }
 0x211   : > { %v3578_v60 = vunpack.i.h.bf16 %v3576_v17  ;;  %v3577_v61 = vunpack.i.l.bf16 %v3576_v17  ;;  %v1704_v45 = vsel %vm1690_vm8, %v1687_v52, %v1541_v47  ;;  %v3661_v17 = vld [vmem:[%s4970_s7 + $0x28] sm:$0xff]  }
 0x212   : > { %3148 = vmatpush3.bf16.msra.mxu0 %v3655_v32 }
 0x213   : > { %v1721_v51 = vsel %vm1707_vm9, %v1704_v45, %v3578_v60  ;;  %v1720_v43 = vsel %vm1707_vm9, %v1703_v13, %v3577_v61  ;;  %3149 = vmatprep.subr.bf16.mxu0 %v3656_v30  ;;  %v3662_v60 = vld [vmem:[%s4970_s7 + $0x70] sm:$0xff]  }
 0x214   : > { %v3581_v0 = vpop.permute.xlu0 %3580  ;;  %v1387_v59 = vpop.permute.xlu1 %1386  ;;  %v1736_v24 = vpack.c.bf16 %v1721_v51, %v1720_v43  ;;  %v3663_v13 = vld [vmem:[%s4970_s7 + $0x30] sm:$0xff]   ;;  %v3664_v43 = vld [vmem:[%s4970_s7 + $0x78] sm:$0xff]  }
 0x215   : > { %v3583_v9 = vunpack.i.h.bf16 %v3581_v0  ;;  %v3582_v34 = vunpack.i.l.bf16 %v3581_v0  ;;  %v1655_v10 = vsel %vm1639_vm5, %v1638_v5, %v1387_v59  ;;  %v3666_v0 = vld [vmem:[%s4970_s7 + $0x38] sm:$0xff]   ;;  %v3667_v59 = vld [vmem:[%s4968_s5] sm:$0xff]  }
 0x216   : > { %1924 = vmatmul.mubr.bf16.gmra.mrb[24].mxu1 %v1736_v24  ;;  %3150 = vmatpush3.bf16.msra.mxu0 %v3657_v53 }
 0x217   : > { %2989 = vmatprep.mubr.msk.bf16.mxu1 %vm1611_vm3, %v4361_v1  ;;  %v1671_v54 = vsel %vm1656_vm6, %v1654_v50, %v3582_v34  ;;  %v1672_v16 = vsel %vm1656_vm6, %v1655_v10, %v3583_v9  ;;  %3151 = vmatprep.subr.bf16.mxu0 %v3658_v48  ;;  %v3670_v9 = vld [vmem:[%s4968_s5 + $0x50] sm:$0xff]   ;;  %v3672_v50 = vld [vmem:[%s4968_s5 + $0x58] sm:$0xff]  }
 0x218   : > { %v3586_v14 = vpop.permute.xlu1 %3585  ;;  %3112 = vmatpush3.bf16.msra.mxu1 %v3667_v59 }
 0x219   : > { %v3588_v18 = vunpack.i.h.bf16 %v3586_v14  ;;  %v3587_v15 = vunpack.i.l.bf16 %v3586_v14  ;;  %3113 = vmatprep.subr.bf16.mxu1 %v3668_v27  ;;  %v3671_v14 = vld [vmem:[%s4968_s5 + $0x10] sm:$0xff]  }
 0x21a   : > { %v3591_v35 = vpop.permute.xlu0 %3590  ;;  %3152 = vmatpush3.bf16.msra.mxu0 %v3659_v25 }
 0x21b   : > { %v1689_v36 = vsel %vm1673_vm7, %v1672_v16, %v3588_v18  ;;  %v1688_v7 = vsel %vm1673_vm7, %v1671_v54, %v3587_v15  ;;  %v3593_v55 = vunpack.i.h.bf16 %v3591_v35  ;;  %v3592_v2 = vunpack.i.l.bf16 %v3591_v35  ;;  %3153 = vmatprep.subr.bf16.mxu0 %v3660_v41  ;;  %v3673_v15 = vld [vmem:[%s4968_s5 + $0x18] sm:$0xff]   ;;  %v3674_v54 = vld [vmem:[%s4968_s5 + $0x60] sm:$0xff]   ;;  %v3676_v35 = vld [vmem:[%s4968_s5 + $0x68] sm:$0xff]  }
 0x21c   : > { %v3596_v26 = vpop.permute.xlu1 %3595  ;;  %3114 = vmatpush3.bf16.msra.mxu1 %v3669_v4  ;;  %v3675_v16 = vld [vmem:[%s4968_s5 + $0x20] sm:$0xff]  }
 0x21d   : > { %v1705_v1 = vsel %vm1690_vm8, %v1688_v7, %v3592_v2  ;;  %v1706_v29 = vsel %vm1690_vm8, %v1689_v36, %v3593_v55  ;;  %v3598_v19 = vunpack.i.h.bf16 %v3596_v26  ;;  %v3597_v31 = vunpack.i.l.bf16 %v3596_v26  ;;  %3115 = vmatprep.subr.bf16.mxu1 %v3670_v9  ;;  %v3677_v36 = vld [vmem:[%s4968_s5 + $0x28] sm:$0xff]   ;;  %v3678_v7 = vld [vmem:[%s4968_s5 + $0x70] sm:$0xff]   ;;  %v3680_v2 = vld [vmem:[%s4968_s5 + $0x78] sm:$0xff]  }
 0x21e   : > { %3154 = vmatpush3.bf16.msra.mxu0 %v3661_v17  ;;  %v3679_v55 = vld [vmem:[%s4968_s5 + $0x30] sm:$0xff]   ;;  %v3681_v26 = vld [vmem:[%s4968_s5 + $0x38] sm:$0xff]  }
 0x21f   : > { %v1722_v33 = vsel %vm1707_vm9, %v1705_v1, %v3597_v31  ;;  %v1723_v8 = vsel %vm1707_vm9, %v1706_v29, %v3598_v19  ;;  %3155 = vmatprep.subr.bf16.mxu0 %v3662_v60 }
 0x220   : > { %v1738_v20 = vpack.c.bf16 %v1723_v8, %v1722_v33  ;;  %3116 = vmatpush3.bf16.msra.mxu1 %v3671_v14 }
 0x221   : > { %3117 = vmatprep.subr.bf16.mxu1 %v3672_v50 }
 0x222   : > { %1932 = vmatmul.mubr.bf16.gmra.mrb[28].mxu1 %v1738_v20  ;;  %3156 = vmatpush3.bf16.msra.mxu0 %v3663_v13 }
 0x223   : > { %3157 = vmatprep.subr.bf16.mxu0 %v3664_v43 }
 0x224   : > { %3118 = vmatpush3.bf16.msra.mxu1 %v3673_v15 }
 0x225   : > { %3119 = vmatprep.subr.bf16.mxu1 %v3674_v54 }
 0x226   : > { %3158 = vmatpush3.bf16.msra.mxu0 %v3666_v0 }
 0x227   : > { %3277 = vmatprep.subr.bf16.mxu0 %v3779_v62 }
 0x228   : > { %3120 = vmatpush3.bf16.msra.mxu1 %v3675_v16 }
 0x229   : > { %3121 = vmatprep.subr.bf16.mxu1 %v3676_v35 }
 0x22c   : > { %3122 = vmatpush3.bf16.msra.mxu1 %v3677_v36 }
 0x22d   : > { %3123 = vmatprep.subr.bf16.mxu1 %v3678_v7 }
 0x230   : > { %3124 = vmatpush3.bf16.msra.mxu1 %v3679_v55  ;;  %v2015_v55 = vsel %vm1625_vm4, 0.0, %v3402_v12 }
 0x231   : > { %3125 = vmatprep.subr.bf16.mxu1 %v3680_v2 }
 0x234   : > { %3126 = vmatpush3.bf16.msra.mxu1 %v3681_v26 }
 0x296   : > { %v4617_v21 = vpop.f32.mrb[0].mxu1 }
 0x297   : > { %v1879_v23 = vpop.f32.mrb[1].mxu1  ;;  %v1878_v16 = vadd.f32 %v4637_v49, %v4617_v21 }
 0x298   : > { %v1880_v6 = vpop.f32.mrb[2].mxu1 }
 0x299   : > { %v1882_v46 = vpop.f32.mrb[3].mxu1  ;;  %v1881_v44 = vadd.f32 %v4637_v49, %v1880_v6  ;;  %v1940_v26 = vmax.f32 %v1878_v16, 0.0  ;;  %v3690_v16 = vld [vmem:[%s4970_s7 + $0xc8] sm:$0xff]  }
 0x29b   : > { %v1941_v61 = vmax.f32 %v1881_v44, 0.0 }
 0x29e   : > { %v4639_v28 = vpop.f32.mrb[4].mxu1 }
 0x29f   : > { %v1887_v22 = vpop.f32.mrb[5].mxu1  ;;  %v1886_v35 = vadd.f32 %v4637_v49, %v4639_v28 }
 0x2a0   : > { %v1888_v52 = vpop.f32.mrb[6].mxu1 }
 0x2a1   : > { %v1889_v47 = vadd.f32 %v4637_v49, %v1888_v52  ;;  %v1890_v57 = vpop.f32.mrb[7].mxu1 }
 0x2a3   : > { %v1943_v45 = vmax.f32 %v1889_v47, 0.0  ;;  %v3682_v47 = vld [vmem:[%s4968_s5 + $0x80] sm:$0xff]  }
 0x2a4   : > { %3269 = vmatprep.subr.bf16.mxu1 %v3682_v47 }
 0x2a5   : > { %v3599_v51 = vpack.i.bf16 %v1943_v45, %v1941_v61 }
 0x2a7   : > { %3600 = vrot.lane.b32.xlu0 %v3599_v51, %s4990_s24 }
 0x2ae   : > { %v1893_v24 = vpop.f32.mrb[8].mxu1 }
 0x2af   : > { %v1895_v56 = vpop.f32.mrb[9].mxu1  ;;  %v1894_v1 = vadd.f32 %v4637_v49, %v1893_v24 }
 0x2b0   : > { %v1896_v5 = vpop.f32.mrb[10].mxu1 }
 0x2b1   : > { %v1897_v34 = vadd.f32 %v4637_v49, %v1896_v5  ;;  %v1898_v10 = vpop.f32.mrb[11].mxu1  ;;  %v1944_v8 = vmax.f32 %v1894_v1, 0.0  ;;  %v1942_v1 = vmax.f32 %v1886_v35, 0.0  ;;  %v3691_v35 = vld [vmem:[%s4970_s7 + $0x88] sm:$0xff]  }
 0x2b3   : > { %v4676_v3 = vmax.f32 %v1897_v34, 0.0 }
 0x2b5   : > { %v3604_v18 = vpack.i.bf16 %v4676_v3, %v3779_v62 }
 0x2b7   : > { %3605 = vrot.lane.b32.xlu1 %v3604_v18, %s4991_s25  ;;  %v3707_v18 = vld [vmem:[%s4972_s9 + $0x18] sm:$0xff]  }
 0x2bb   : > { %1977 = vrot.lane.b32.xlu1 %v1941_v61, %s4992_s15 }
 0x2ce   : > { %v1901_v29 = vpop.f32.mrb[12].mxu1 }
 0x2cf   : > { %v1902_v19 = vadd.f32 %v4637_v49, %v1901_v29  ;;  %v1903_v31 = vpop.f32.mrb[13].mxu1 }
 0x2d0   : > { %v1904_v33 = vpop.f32.mrb[14].mxu1 }
 0x2d1   : > { %v1946_v20 = vmax.f32 %v1902_v19, 0.0  ;;  %v1906_v37 = vpop.f32.mrb[15].mxu1  ;;  %v4727_v52 = vadd.f32 %v4637_v49, %v1904_v33 }
 0x2d3   : > { %v3614_v38 = vpack.i.bf16 %v1946_v20, %v1944_v8  ;;  %v1947_v45 = vmax.f32 %v4727_v52, 0.0  ;;  %v3687_v52 = vld [vmem:[%s4970_s7 + $0x118] sm:$0xff]  }
 0x2d5   : > { %3615 = vrot.lane.b32.xlu1 %v3614_v38, %s4990_s24  ;;  %3610 = vrot.lane.b32.xlu0 %v3614_v38, %s4992_s15 }
 0x2d6   : > { %v4719_v58 = vpop.f32.mrb[16].mxu1 }
 0x2d7   : > { %v1911_v42 = vpop.f32.mrb[17].mxu1 }
 0x2d8   : > { %v1912_v40 = vpop.f32.mrb[18].mxu1 }
 0x2d9   : > { %v1914_v32 = vpop.f32.mrb[19].mxu1  ;;  %v1913_v6 = vadd.f32 %v4637_v49, %v1912_v40 }
 0x2db   : > { %v1949_v25 = vmax.f32 %v1913_v6, 0.0  ;;  %v3683_v6 = vld [vmem:[%s4968_s5 + $0x88] sm:$0xff]  }
 0x2de   : > { %v4721_v23 = vpop.f32.mrb[20].mxu1 }
 0x2df   : > { %v1919_v46 = vpop.f32.mrb[21].mxu1 }
 0x2e0   : > { %v1920_v30 = vpop.f32.mrb[22].mxu1  ;;  %v1910_v46 = vadd.f32 %v4637_v49, %v4719_v58 }
 0x2e1   : > { %v1921_v53 = vadd.f32 %v4637_v49, %v1920_v30  ;;  %v1922_v48 = vpop.f32.mrb[23].mxu1 }
 0x2e3   : > { %v1951_v41 = vmax.f32 %v1921_v53, 0.0  ;;  %v1948_v53 = vmax.f32 %v1910_v46, 0.0 }
 0x2e5   : > { %v3619_v44 = vpack.i.bf16 %v1951_v41, %v1949_v25 }
 0x2e7   : > { %3620 = vrot.lane.b32.xlu0 %v3619_v44, %s4990_s24  ;;  %s2936_s24 = sshll.u32 %s4043_s30, 3 }
 0x2e8   : > { %s670_s12 = scalar_lea.vmem [#allocation3], %s2936_s24 }
 0x2e9   : > { %v1925_v22 = vpop.f32.mrb[24].mxu1  ;;  %s2864_s22 = sshll.u32 %s670_s12, 4  ;;  %s4921_s22 = int_to_ptr.vmem [resolvable:$true] %s2864_s22 }
 0x2ea   : > { %v1927_v17 = vpop.f32.mrb[25].mxu1  ;;  %v1926_v43 = vadd.f32 %v4637_v49, %v1925_v22  ;;  %s3712_s2 = scalar_lea.vmem %s4921_s22, 128 }
 0x2eb   : > { %v1928_v57 = vpop.f32.mrb[26].mxu1  ;;  %p3713_p13 = scmp.ne.s32.totalorder %s4921_s22, %s3712_s2 }
 0x2ec   : > { %v1929_v60 = vadd.f32 %v4637_v49, %v1928_v57  ;;  %v1930_v61 = vpop.f32.mrb[27].mxu1  ;;  %v1952_v56 = vmax.f32 %v1926_v43, 0.0 }
 0x2ed   : > { %p3714_p0 = pnand %p3713_p13, %p3886_p6 }
 0x2ee   : > { %v1953_v13 = vmax.f32 %v1929_v60, 0.0  ;;  %v1918_v60 = vadd.f32 %v4637_v49, %v4721_v23 }
 0x2ef   : > { %p3715_p1 = pneg %p3714_p0 }
 0x2f0   : > { %v3624_v51 = vpack.i.bf16 %v1947_v45, %v1953_v13  ;;  %v1950_v43 = vmax.f32 %v1918_v60, 0.0  ;;  %v3703_v60 = vld [vmem:[%s4970_s7 + $0xb8] sm:$0xff]  }
 0x2f2   : > { %3625 = vrot.lane.b32.xlu0 %v3624_v51, %s4991_s25 }
 0x2f5   : > { %v1933_v63 = vpop.f32.mrb[28].mxu1 }
 0x2f6   : > { %v1934_v0 = vadd.f32 %v4637_v49, %v1933_v63  ;;  %v1935_v59 = vpop.f32.mrb[29].mxu1  ;;  %1979 = vrot.lane.b32.xlu0 %v1949_v25, %s4992_s15 }
 0x2f7   : > { %v1936_v24 = vpop.f32.mrb[30].mxu1 }
 0x2f8   : > { %v1954_v27 = vmax.f32 %v1934_v0, 0.0  ;;  %v1937_v4 = vadd.f32 %v4637_v49, %v1936_v24  ;;  %v1938_v5 = vpop.f32.mrb[31].mxu1 }
 0x2fa   : > { %v3629_v9 = vpack.i.bf16 %v1954_v27, %v1952_v56  ;;  %v1955_v34 = vmax.f32 %v1937_v4, 0.0 }
 0x2fc   : > { %v4741_v10 = vpack.c.bf16 %v1955_v34, %v1953_v13  ;;  %3630 = vrot.lane.b32.xlu1 %v3629_v9, %s4992_s15 }
 0x319   : > { %v3601_v54 = vpop.permute.xlu0 %3600 }
 0x31a   : > { %v3603_v36 = vunpack.i.h.bf16 %v3601_v54  ;;  %v3602_v7 = vunpack.i.l.bf16 %v3601_v54  ;;  %v3684_v54 = vld [vmem:[%s4970_s7 + $0x100] sm:$0xff]  }
 0x31c   : > { %v2026_v33 = vsel %vm1625_vm4, %v1942_v1, %v3603_v36  ;;  %v2025_v21 = vsel %vm1625_vm4, %v1940_v26, %v3602_v7  ;;  %v3692_v36 = vld [vmem:[%s4970_s7 + $0xd0] sm:$0xff]   ;;  %v3696_v26 = vld [vmem:[%s4970_s7 + $0xe0] sm:$0xff]  }
 0x31d   : > { %v3693_v7 = vld [vmem:[%s4970_s7 + $0x90] sm:$0xff]   ;;  %v3697_v1 = vld [vmem:[%s4970_s7 + $0xa0] sm:$0xff]  }
 0x329   : > { %v3606_v14 = vpop.permute.xlu1 %3605 }
 0x32a   : > { %v3607_v50 = vunpack.i.l.bf16 %v3606_v14  ;;  %v3608_v2 = vunpack.i.h.bf16 %v3606_v14 }
 0x32c   : > { %v3051_v15 = vpack.c.bf16 %v3607_v50, %v3607_v50  ;;  %v2018_v29 = vsel %vm1656_vm6, %v2015_v55, %v3607_v50  ;;  %v2030_v28 = vsel %vm1656_vm6, %v2026_v33, %v3608_v2  ;;  %v2029_v37 = vsel %vm1656_vm6, %v2025_v21, %v3607_v50  ;;  %v3694_v55 = vld [vmem:[%s4970_s7 + $0xd8] sm:$0xff]   ;;  %v3701_v33 = vld [vmem:[%s4970_s7 + $0xb0] sm:$0xff]  }
 0x32d   : > { %v1978_v19 = vpop.permute.xlu1 %1977  ;;  %v2021_v11 = vsel %vm1690_vm8, %v2018_v29, %v4385_v39 }
 0x32e   : > { %3052 = vmatprep.mubr.msk.bf16.mxu0 %vm4745_vm11, %v3051_v15  ;;  %v2022_v12 = vsel %vm1690_vm8, %v2018_v29, %v1978_v19  ;;  %v3698_v29 = vld [vmem:[%s4970_s7 + $0xe8] sm:$0xff]  }
 0x32f   : > { %3057 = vmatmul.mubr.msk.bf16.vlgmr.msra.gmra.mrb[64].mxu0 %vm4745_vm11, %v3051_v15  ;;  %v2037_v32 = vpack.c.bf16 %v2022_v12, %v2021_v11  ;;  %v2039_v15 = vpack.c.bf16 %v1947_v45, %v4676_v3  ;;  %v3688_v45 = vld [vmem:[%s4970_s7 + $0xc0] sm:$0xff]   ;;  %v3699_v19 = vld [vmem:[%s4970_s7 + $0xa8] sm:$0xff]  }
 0x330   : > { %3278 = vmatpush3.bf16.msra.mxu0 %v3684_v54  ;;  %3285 = vmatprep.mubr.msk.bf16.mxu0 %vm3786_vm12, %v3779_v62 }
 0x331   : > { %3279 = vmatprep.subr.bf16.mxu0 %v3779_v62 }
 0x347   : > { %v3611_v31 = vpop.permute.xlu0 %3610  ;;  %v3616_v44 = vpop.permute.xlu1 %3615 }
 0x348   : > { %v3613_v8 = vunpack.i.h.bf16 %v3611_v31  ;;  %v3612_v20 = vunpack.i.l.bf16 %v3611_v31  ;;  %v3618_v17 = vunpack.i.h.bf16 %v3616_v44  ;;  %v3617_v57 = vunpack.i.l.bf16 %v3616_v44  ;;  %v3700_v31 = vld [vmem:[%s4970_s7 + $0xf0] sm:$0xff]  }
 0x34a   : > { %v2033_v38 = vsel %vm1690_vm8, %v2029_v37, %v3612_v20  ;;  %v2034_v42 = vsel %vm1690_vm8, %v2030_v28, %v3613_v8  ;;  %v2016_v13 = vsel %vm1625_vm4, 0.0, %v3617_v57  ;;  %v2017_v58 = vsel %vm1625_vm4, %v4676_v3, %v3618_v17  ;;  %v3686_v3 = vld [vmem:[%s4970_s7 + $0x110] sm:$0xff]   ;;  %v3702_v57 = vld [vmem:[%s4970_s7 + $0xf8] sm:$0xff]  }
 0x34b   : > { %v2038_v40 = vpack.c.bf16 %v2034_v42, %v2033_v38  ;;  %v2019_v56 = vsel %vm1656_vm6, %v2016_v13, %v3608_v2  ;;  %v3695_v2 = vld [vmem:[%s4970_s7 + $0x98] sm:$0xff]   ;;  %v2990_v38 = vld [vmem:[%s4969_s6] ss:$0 sm:$0xff] }
 0x34c   : > { %v2023_v34 = vsel %vm1690_vm8, %v2019_v56, %v4385_v39  ;;  %v3685_v39 = vld [vmem:[%s4970_s7 + $0x108] sm:$0xff]  }
 0x34d   : > { %2232 = vmatprep.mubr.bf16.mxu1 %v2038_v40  ;;  %3280 = vmatpush3.bf16.msra.mxu0 %v3685_v39  ;;  %v3705_v39 = vld [vmem:[%s4972_s9 + $0x8] sm:$0xff]  }
 0x34e   : > { %2233 = vmatmul.mubr.bf16.vlgmr.msra.gmra.mrb[32].mxu1 %v2037_v32  ;;  %3281 = vmatprep.subr.bf16.mxu0 %v3779_v62 }
 0x34f   : > { %3270 = vmatpush3.bf16.msra.mxu1 %v3682_v47 }
 0x350   : > { %3271 = vmatprep.subr.bf16.mxu1 %v3683_v6 }
 0x351   : > { %3282 = vmatpush3.bf16.msra.mxu0 %v3686_v3  ;;  %v3706_v3 = vld [vmem:[%s4972_s9 + $0x10] sm:$0xff]  }
 0x352   : > { %3283 = vmatprep.subr.bf16.mxu0 %v3779_v62 }
 0x353   : > { %3272 = vmatpush3.bf16.msra.mxu1 %v3683_v6 }
 0x354   : > { %3165 = vmatprep.subr.bf16.mxu1 %v3688_v45  ;;  %v3709_v45 = vld [vmem:[%s4972_s9 + $0x28] sm:$0xff]  }
 0x355   : > { %3284 = vmatpush3.bf16.msra.mxu0 %v3687_v52  ;;  %v3708_v52 = vld [vmem:[%s4972_s9 + $0x20] sm:$0xff]  }
 0x359   : > { %v3621_v30 = vpop.permute.xlu0 %3620 }
 0x35a   : > { %v3622_v48 = vunpack.i.l.bf16 %v3621_v30  ;;  %v3623_v61 = vunpack.i.h.bf16 %v3621_v30 }
 0x35c   : > { %v2027_v25 = vsel %vm1625_vm4, %v1948_v53, %v3622_v48  ;;  %v2028_v24 = vsel %vm1625_vm4, %v1950_v43, %v3623_v61 }
 0x35d   : > { %v2031_v41 = vsel %vm1656_vm6, %v2027_v25, %v3607_v50 }
 0x364   : > { %v3626_v22 = vpop.permute.xlu0 %3625 }
 0x365   : > { %v3628_v47 = vunpack.i.h.bf16 %v3626_v22  ;;  %v3627_v51 = vunpack.i.l.bf16 %v3626_v22 }
 0x367   : > { %v2020_v0 = vsel %vm1656_vm6, %v2017_v58, %v3628_v47  ;;  %v2032_v49 = vsel %vm1656_vm6, %v2028_v24, %v3627_v51 }
 0x368   : > { %v1980_v63 = vpop.permute.xlu0 %1979 }
 0x369   : > { %v2024_v23 = vsel %vm1690_vm8, %v2020_v0, %v1980_v63 }
 0x36a   : > { %v2040_v50 = vpack.c.bf16 %v2024_v23, %v2023_v34 }
 0x36e   : > { %v3631_v59 = vpop.permute.xlu1 %3630 }
 0x36f   : > { %v3633_v27 = vunpack.i.h.bf16 %v3631_v59  ;;  %v3632_v4 = vunpack.i.l.bf16 %v3631_v59 }
 0x371   : > { %v2035_v5 = vsel %vm1690_vm8, %v2031_v41, %v3632_v4  ;;  %v2036_v9 = vsel %vm1690_vm8, %v2032_v49, %v3633_v27 }
 0x372   : > { %v2041_v14 = vpack.c.bf16 %v2036_v9, %v2035_v5 }
 0x374   : > { %2240 = vmatprep.mubr.bf16.mxu1 %v2041_v14 }
 0x375   : > { %2241 = vmatmul.mubr.bf16.gmra.mrb[36].mxu1 %v2040_v50 }
 0x376   : > { %3273 = vmatprep.mubr.msk.bf16.mxu1 %vm1625_vm4, %v2039_v15  ;;  %v3704_v15 = vld [vmem:[%s4972_s9] sm:$0xff]  }
 0x37d   : > { %3274 = vmatmul.mubr.msk.bf16.vlgmr.msra.gmra.mrb[40].mxu1 %vm1625_vm4, %v4741_v10  ;;  %v3689_v10 = vld [vmem:[%s4970_s7 + $0x80] sm:$0xff]  }
 0x37e   : > { %3166 = vmatpush3.bf16.msra.mxu1 %v3689_v10 }
 0x37f   : > { %3167 = vmatprep.subr.bf16.mxu1 %v3690_v16  ;;  %v3710_v16 = vld [vmem:[%s4972_s9 + $0x30] sm:$0xff]  }
 0x382   : > { %3168 = vmatpush3.bf16.msra.mxu1 %v3691_v35 }
 0x383   : > { %3169 = vmatprep.subr.bf16.mxu1 %v3692_v36 }
 0x386   : > { %3170 = vmatpush3.bf16.msra.mxu1 %v3693_v7 }
 0x387   : > { %3171 = vmatprep.subr.bf16.mxu1 %v3694_v55  ;;  %v3711_v55 = vld [vmem:[%s4972_s9 + $0x38] sm:$0xff]  }
 0x38a   : > { %3172 = vmatpush3.bf16.msra.mxu1 %v3695_v2  ;;  %v3011_v2 = vld [vmem:[%s4971_s8] ss:$0 sm:$0xff] }
 0x38b   : > { %3173 = vmatprep.subr.bf16.mxu1 %v3696_v26 }
 0x38e   : > { %3174 = vmatpush3.bf16.msra.mxu1 %v3697_v1 }
 0x38f   : > { %3175 = vmatprep.subr.bf16.mxu1 %v3698_v29 }
 0x392   : > { %3176 = vmatpush3.bf16.msra.mxu1 %v3699_v19 }
 0x393   : > { %3177 = vmatprep.subr.bf16.mxu1 %v3700_v31 }
 0x396   : > { %3178 = vmatpush3.bf16.msra.mxu1 %v3701_v33 }
 0x397   : > { %3179 = vmatprep.subr.bf16.mxu1 %v3702_v57 }
 0x39a   : > { %3180 = vmatpush3.bf16.msra.mxu1 %v3703_v60 }
 0x39b   : > { %3289 = vmatprep.subr.bf16.mxu1 %v3779_v62 }
 0x402   : > { %v3159_v21 = vpop.f32.mrb[64].mxu0 }
 0x403   : > { %v3160_v8 = vpop.f32.mrb[65].mxu0 }
 0x404   : > { %v4856_v20 = vadd.f32 %v3160_v8, %v3159_v21  ;;  %v3162_v28 = vpop.f32.mrb[66].mxu0 }
 0x405   : > { %v3163_v11 = vpop.f32.mrb[67].mxu0 }
 0x406   : > { %v2650_v29 = vadd.f32 %v4856_v20, %v3011_v2  ;;  %v3064_v11 = vld [vmem:[%s4973_s10] ss:$0 sm:$0xff] }
 0x421   : > { %v3127_v12 = vpop.f32.mrb[32].mxu1 }
 0x422   : > { %v3128_v37 = vpop.f32.mrb[33].mxu1 }
 0x423   : > { %v3129_v42 = vadd.f32 %v3128_v37, %v3127_v12  ;;  %v3130_v40 = vpop.f32.mrb[34].mxu1 }
 0x424   : > { %v3131_v32 = vpop.f32.mrb[35].mxu1 }
 0x425   : > { %v3132_v6 = vadd.f32 %v3131_v32, %v3130_v40  ;;  %v2235_v46 = vadd.f32 %v3129_v42, %v2990_v38 }
 0x427   : > { %v2238_v43 = vadd.f32 %v3132_v6, %v2990_v38 }
 0x448   : > { %v3133_v30 = vpop.f32.mrb[36].mxu1 }
 0x449   : > { %v3134_v53 = vpop.f32.mrb[37].mxu1 }
 0x44a   : > { %v3135_v48 = vadd.f32 %v3134_v53, %v3133_v30  ;;  %v3136_v25 = vpop.f32.mrb[38].mxu1 }
 0x44b   : > { %v3137_v41 = vpop.f32.mrb[39].mxu1 }
 0x44c   : > { %v3138_v44 = vadd.f32 %v3137_v41, %v3136_v25  ;;  %v2243_v22 = vadd.f32 %v3135_v48, %v2990_v38 }
 0x44e   : > { %v2246_v13 = vadd.f32 %v3138_v44, %v2990_v38 }
 0x450   : > { %v3275_v17 = vpop.f32.mrb[40].mxu1 }
 0x451   : > { %v2292_v47 = vadd.f32 %v3275_v17, %v2243_v22  ;;  %v2283_v61 = vpop.f32.mrb[41].mxu1 }
 0x452   : > { %v2284_v51 = vadd.f32 %v2283_v61, %v2235_v46  ;;  %v3276_v58 = vpop.f32.mrb[42].mxu1 }
 0x453   : > { %v2295_v63 = vadd.f32 %v3276_v58, %v2246_v13  ;;  %v2286_v0 = vpop.f32.mrb[43].mxu1  ;;  %v2300_v56 = vmax.f32 %v2292_v47, 0.0 }
 0x454   : > { %v2287_v59 = vadd.f32 %v2286_v0, %v2238_v43  ;;  %v2298_v5 = vmax.f32 %v2284_v51, 0.0 }
 0x455   : > { %v2301_v24 = vmax.f32 %v2295_v63, 0.0 }
 0x456   : > { %v2299_v27 = vmax.f32 %v2287_v59, 0.0 }
 0x457   : > { %v2316_v4 = vpack.c.bf16 %v2301_v24, %v2301_v24 }
 0x458   : > { %v3634_v49 = vpack.i.bf16 %v2300_v56, %v2299_v27 }
 0x459   : > { %3286 = vmatmul.mubr.msk.bf16.vlgmr.msra.gmra.mrb[68].mxu0 %vm1656_vm6, %v2316_v4 }
 0x45a   : > { %3635 = vrot.lane.b32.xlu1 %v3634_v49, %s4991_s25  ;;  %s3787_s25 = smov [#allocation3]  }
 0x45b   : > { %s3716_s24 = sshll.u32 %s3787_s25, 4  ;;  %s3717_s24 = int_to_ptr.vmem [resolvable:$false] %s3716_s24 }
 0x45c   : > { %s3718_s15 = scalar_lea.vmem %s3717_s24, 256  ;;  %p3719_p2 = scmp.lt.s32.totalorder %s4921_s22, %s3717_s24 }
 0x45d   : > { %p3720_p3 = scmp.lt.s32.totalorder %s3718_s15, %s3712_s2 }
 0x45f   : > { %p3721_p4 = por %p3720_p3, %p3719_p2 }
 0x461   : > { %p3722_p5 = pnand %p3721_p4, %p3715_p1 }
 0x4cc   : > { %v3636_v23 = vpop.permute.xlu1 %3635 }
 0x4cd   : > { %v3638_v9 = vunpack.i.h.bf16 %v3636_v23  ;;  %v3637_v34 = vunpack.i.l.bf16 %v3636_v23 }
 0x4cf   : > { %v3061_v14 = vpack.c.bf16 %v3638_v9, %v3638_v9  ;;  %v2311_v50 = vsel %vm1656_vm6, %v2298_v5, %v3637_v34 }
 0x4d0   : > { %v2314_v54 = vpack.c.bf16 %v2311_v50, %v2311_v50 }
 0x4d1   : > { %3062 = vmatprep.mubr.msk.bf16.mxu1 %vm4745_vm11, %v3061_v14 }
 0x4d2   : > { %2688 = vmatmul.mubr.bf16.vlgmr.msra.gmra.mrb[44].mxu1 %v2314_v54 }
 0x4d3   : > { %3290 = vmatpush3.bf16.msra.mxu1 %v3704_v15  ;;  %3305 = vmatprep.mubr.msk.bf16.mxu1 %vm3786_vm12, %v3779_v62 }
 0x4d4   : > { %3291 = vmatprep.subr.bf16.mxu1 %v3779_v62 }
 0x4d7   : > { %3292 = vmatpush3.bf16.msra.mxu1 %v3705_v39 }
 0x4d8   : > { %3293 = vmatprep.subr.bf16.mxu1 %v3779_v62 }
 0x4db   : > { %3294 = vmatpush3.bf16.msra.mxu1 %v3706_v3 }
 0x4dc   : > { %3295 = vmatprep.subr.bf16.mxu1 %v3779_v62 }
 0x4df   : > { %3296 = vmatpush3.bf16.msra.mxu1 %v3707_v18 }
 0x4e0   : > { %3297 = vmatprep.subr.bf16.mxu1 %v3779_v62 }
 0x4e3   : > { %3298 = vmatpush3.bf16.msra.mxu1 %v3708_v52 }
 0x4e4   : > { %3299 = vmatprep.subr.bf16.mxu1 %v3779_v62 }
 0x4e7   : > { %3300 = vmatpush3.bf16.msra.mxu1 %v3709_v45 }
 0x4e8   : > { %3301 = vmatprep.subr.bf16.mxu1 %v3779_v62 }
 0x4eb   : > { %3302 = vmatpush3.bf16.msra.mxu1 %v3710_v16 }
 0x4ec   : > { %3303 = vmatprep.subr.bf16.mxu1 %v3779_v62 }
 0x4ef   : > { %3304 = vmatpush3.bf16.msra.mxu1 %v3711_v55 }
 0x52c   : > { %v2729_v10 = vpop.f32.mrb[68].mxu0 }
 0x52d   : > { %v3287_v35 = vpop.f32.mrb[69].mxu0 }
 0x52e   : > { %v2732_v36 = vpop.f32.mrb[70].mxu0 }
 0x52f   : > { %v3288_v7 = vpop.f32.mrb[71].mxu0 }
 0x5a5   : > { %v3181_v26 = vpop.f32.mrb[44].mxu1 }
 0x5a6   : > { %v3182_v1 = vpop.f32.mrb[45].mxu1 }
 0x5a7   : > { %v3183_v19 = vadd.f32 %v3182_v1, %v3181_v26  ;;  %v3184_v31 = vpop.f32.mrb[46].mxu1 }
 0x5a8   : > { %v3185_v33 = vpop.f32.mrb[47].mxu1 }
 0x5a9   : > { %v2690_v21 = vadd.f32 %v3183_v19, %v2650_v29 }
 0x5ab   : > { %v2730_v8 = vadd.f32 %v2729_v10, %v2690_v21 }
 0x5ad   : > { %v2735_v62 = vmax.f32 %v2730_v8, 0.0 }
 0x5af   : > { %v2737_v28 = vpack.c.bf16 %v2735_v62, %v2735_v62 }
 0x5b1   : > { %3306 = vmatmul.mubr.bf16.vlgmr.msra.gmra.mrb[48].mxu1 %v2737_v28 }
 0x684   : > { %v2843_v20 = vpop.f32.mrb[48].mxu1 }
 0x685   : > { %v2844_v12 = vadd.f32 %v3064_v11, %v2843_v20  ;;  %v3307_v37 = vpop.f32.mrb[49].mxu1 }
 0x686   : > { %v2846_v38 = vpop.f32.mrb[50].mxu1 }
 0x687   : > { %2849 = vst [vmem:[%s670_s12] sm:$0xff] %v2844_v12  ;;  %v3308_v42 = vpop.f32.mrb[51].mxu1 }
 0x688   : > { %3725 = shalt.err (!%p3722_p5)
}
 0x689   : > { %s3726_s30 = scalar_lea.hbm %s4919_s16, 128  ;;  %s3730_s14 = scalar_lea.hbm %s4974_s11, 256 }
 0x68a   : > { %p3727_p7 = scmp.ne.s32.totalorder %s4919_s16, %s3726_s30  ;;  %p3731_p12 = scmp.lt.u32.totalorder %s4919_s16, %s4974_s11 }
 0x68b   : > { %p3732_p13 = scmp.lt.u32.totalorder %s3730_s14, %s3726_s30  ;;  %p3734_p1 = scmp.lt.u32.totalorder %s3726_s30, %s4919_s16 }
 0x68c   : > { %p3728_p10 = pnand %p3727_p7, %p3886_p6 }
 0x68d   : > { %p3733_p0 = por %p3732_p13, %p3731_p12 }
 0x68e   : > { %p3729_p11 = pneg %p3728_p10 }
 0x68f   : > { %p3735_p2 = por %p3734_p1, %p3733_p0 }
 0x691   : > { %p3736_p3 = pnand %p3735_p2, %p3729_p11 }
 0x693   : > { %3739 = shalt.err (!%p3736_p3)
}
 0x694   : > { %3309 = dma.vmem_to_hbm [thread:$0]  (%p3886_p6), %s4921_s22, 128, %s4919_s16, %s2851_s1  }
 0x695 PF: > { %s2876_s13 = sand.u32 1, %s3762_s17   ;;  %p3312_p4 = pnand %p2931_p9, %p3890_p8 }
 0x696   : > { %s2877_s2 = scalar_lea.sflag [#allocation4], %s2876_s13 }
 0x697   : > { %3757 = dma.done.wait (!%p3312_p4), %s2877_s2, 128  }
 0x698   : > { %3759 = vsyncadd (!%p3312_p4), %s2877_s2, 4294967168  ;;  %p21_p5 = scmp.ge.s32.totalorder %s3871_s23, 4   ;;  %s4996_s17 = smov %s3766_s18 }
 0x699   : > { %s4997_s18 = smov %s3770_s19  ;;  %s4998_s19 = smov %s3884_s26 }
 0x69a   : > { %s4999_s20 = smov %s3871_s23  ;;  %23 = sbr.rel (!%p21_p5) target bundleno = 7 (0x7), region = 142 }
 0x6a1   :  { %2882 = vsyncpa [#allocation4], 1 }
 0x6a2   :  { %2884 = vsyncpa [#allocation4 + $0x1], 1 }

</bundles_post_ra>
